<compile_context>
chip_gen: v7x
topology: tpu7x:2x2x1
jax: 0.10.0
libtpu: 0.0.40
codegen_flags: <defaults>
</compile_context>

<pallas_src>
import functools

import jax
import jax.numpy as jnp
from jax.experimental import pallas as pl
from jax.experimental.pallas import tpu as pltpu


# --------------------------------------------------------------------------- #
# Kernels
# --------------------------------------------------------------------------- #
def _small_fused_kernel(x_ref, gamma_ref, y_ref, ma_ref, *, n_elems, eps):
    """Whole-x-in-VMEM path: single HBM read, single write, one launch."""
    xf = x_ref[...].astype(jnp.float32)                     # (B, F, T)
    s = jnp.sum(jnp.abs(xf), axis=0)                        # (F, T)  elementwise adds
    ma = jnp.sum(s, axis=-1, keepdims=True) / n_elems       # (F, 1)  one XLU reduce
    scale = gamma_ref[...] / (10.0 * (ma + eps))            # (F, 1)
    y_ref[...] = jnp.tanh(xf * scale[None, :, :]).astype(y_ref.dtype)
    ma_ref[...] = ma


def _abs_sum_kernel(x_ref, part_ref, acc_ref, *, t_total, t_tile):
    """grid = (B, nt): per-batch partial sums of |x| over time.

    b axis "parallel" (megacore-splittable on v7x), t axis "arbitrary"
    (accumulates into the lane-shaped VMEM scratch).
    """
    t = pl.program_id(1)
    nt = pl.num_programs(1)

    @pl.when(t == 0)
    def _init():
        acc_ref[...] = jnp.zeros_like(acc_ref)

    ax = jnp.abs(x_ref[...].astype(jnp.float32))             # (F, Tt) — VPU only
    rem = t_total % t_tile
    if rem == 0:
        acc_ref[...] += ax
    else:
        # Only the last (ragged) tile pays the iota/compare/where mask.
        @pl.when(t != nt - 1)
        def _full_tile():
            acc_ref[...] += ax

        @pl.when(t == nt - 1)
        def _edge_tile():
            lane = jax.lax.broadcasted_iota(jnp.int32, ax.shape, 1)
            acc_ref[...] += jnp.where(lane < rem, ax, 0.0)

    @pl.when(t == nt - 1)
    def _finalize():
        # Single cross-lane reduce per batch -> raw per-filter |x| sum.
        part_ref[...] = jnp.sum(acc_ref[...], axis=-1, keepdims=True)   # (F, 1)


def _normalize_kernel(x_ref, scale_ref, o_ref, *, compute_dtype):
    """y = tanh(x * scale), scale precomputed per filter."""
    x = x_ref[...].astype(compute_dtype)                     # (F, Tt)
    s = scale_ref[...].astype(compute_dtype)                 # (F, 1)
    o_ref[...] = jnp.tanh(x * s).astype(o_ref.dtype)


# --------------------------------------------------------------------------- #
# Generation-aware sizing helpers
# --------------------------------------------------------------------------- #
def _query_vmem_bytes(default_bytes=64 << 20):
    """Physical VMEM per core.  Explicit conservative (v7x-class) fallback if the
    query is unavailable (AOT / mock compile); override via `vmem_bytes=`."""
    try:
        info = pltpu.get_tpu_info()
        v = getattr(info, "vmem_capacity_bytes", None)
        if v:
            return int(v)
    except Exception:  # pragma: no cover - conservative fallback
        pass
    return int(default_bytes)


def _gen_caps(vmem_bytes):
    """(target x-block bytes, scoped-vmem cap) per VMEM generation."""
    if vmem_bytes >= (100 << 20):            # v5e / v6e: 128 MiB physical VMEM
        return (6 << 20), (100 << 20)        # ~6 MiB blocks, cap ~100 MiB
    # v7x-class: 64 MiB physical per TensorCore
    return (3 << 20), max(vmem_bytes - (12 << 20), 32 << 20)


def _pick_time_tile(num_filters, t_total, x_itemsize, per_tt_bytes,
                    target_block_bytes, vmem_cap):
    """Largest lane (time) tile, multiple of 128, with x-block ~= target and the
    kernel's total resident bytes (per_tt_bytes * Tt) within the VMEM budget."""
    lanes_target = (target_block_bytes // max(1, num_filters * x_itemsize)) // 128 * 128
    budget = max(vmem_cap - (8 << 20), 8 << 20)        # slack for small operands
    lanes_cap = (budget // max(1, per_tt_bytes)) // 128 * 128
    lanes = max(128, min(lanes_target, lanes_cap))
    return t_total if t_total <= lanes else lanes


def _vmem_limit(per_tt_bytes, t_tile, vmem_cap):
    needed = per_tt_bytes * t_tile + (8 << 20)         # + Mosaic internal slack
    return int(min(vmem_cap, max(needed, 32 << 20)))


# --------------------------------------------------------------------------- #
# pallas_call wrappers
# --------------------------------------------------------------------------- #
def _run_normalize(x, scale_col, *, out_dtype, compute_dtype, time_tile,
                   target_block, vmem_cap):
    B, F, T = x.shape
    x_item = jnp.dtype(x.dtype).itemsize
    o_item = jnp.dtype(out_dtype).itemsize
    # No accumulator scratch here -> sized independently of the reduce pass.
    per_tt = F * 2 * (x_item + o_item)                 # double-buffered x + y blocks
    if time_tile is None:
        Tt = _pick_time_tile(F, T, x_item, per_tt, target_block, vmem_cap)
    else:
        Tt = int(time_tile)
    nt = -(-T // Tt)

    return pl.pallas_call(
        functools.partial(_normalize_kernel, compute_dtype=compute_dtype),
        out_shape=jax.ShapeDtypeStruct((B, F, T), out_dtype),
        grid_spec=pltpu.PrefetchScalarGridSpec(
            num_scalar_prefetch=0,
            grid=(B, nt),
            in_specs=[
                pl.BlockSpec((None, F, Tt), lambda b, t: (b, 0, t)),
                pl.BlockSpec((F, 1), lambda b, t: (0, 0)),
            ],
            out_specs=pl.BlockSpec((None, F, Tt), lambda b, t: (b, 0, t)),
        ),
        compiler_params=pltpu.CompilerParams(
            dimension_semantics=("parallel", "parallel"),
            vmem_limit_bytes=_vmem_limit(per_tt, Tt, vmem_cap),
        ),
    )(x, scale_col)


def _run_abs_mean(x, *, time_tile, target_block, vmem_cap):
    B, F, T = x.shape
    x_item = jnp.dtype(x.dtype).itemsize
    per_tt = F * (2 * x_item + 4)                      # double-buffered x + f32 acc
    if time_tile is None:
        Tt = _pick_time_tile(F, T, x_item, per_tt, target_block, vmem_cap)
    else:
        Tt = int(time_tile)
    nt = -(-T // Tt)

    partials = pl.pallas_call(
        functools.partial(_abs_sum_kernel, t_total=T, t_tile=Tt),
        out_shape=jax.ShapeDtypeStruct((B, F, 1), jnp.float32),
        grid_spec=pltpu.PrefetchScalarGridSpec(
            num_scalar_prefetch=0,
            grid=(B, nt),
            in_specs=[pl.BlockSpec((None, F, Tt), lambda b, t: (b, 0, t))],
            out_specs=pl.BlockSpec((None, F, 1), lambda b, t: (b, 0, 0)),
            scratch_shapes=[pltpu.VMEM((F, Tt), jnp.float32)],
        ),
        compiler_params=pltpu.CompilerParams(
            dimension_semantics=("parallel", "arbitrary"),
            vmem_limit_bytes=_vmem_limit(per_tt, Tt, vmem_cap),
        ),
    )(x)
    # Tiny wrapper-side combine of per-batch partial sums (negligible XLA work).
    return jnp.sum(partials, axis=(0, 2)) / float(B * T)          # (F,)


# --------------------------------------------------------------------------- #
# Public wrapper
# --------------------------------------------------------------------------- #
def phase_derivative_compressor(
    x,
    gamma,
    running_ma,
    *,
    eps=1e-5,
    momentum=0.1,
    training=True,
    track_running_stats=True,
    time_tile=None,
    out_dtype=None,
    compute_dtype=None,
    vmem_bytes=None,
):
    """Forward pass.  Returns (y, new_running_ma).

    x          : (B, F, T)  phase-derivative TF representation
    gamma      : (F,) learnable scaling (or None for scaling=False)
    running_ma : (F,) running mean-absolute buffer (or None)
    out_dtype  : dtype of y (default: x.dtype).  bf16 halves write traffic.
    compute_dtype : dtype of the normalize multiply+tanh (default f32; bf16 is
                    safe on v6e/v7x, keep f32 on v5e).
    """
    B, F, T = x.shape
    out_dtype = x.dtype if out_dtype is None else out_dtype
    compute_dtype = jnp.float32 if compute_dtype is None else compute_dtype
    if gamma is None:                       # scaling=False -> x / (10*(ma+eps))
        gamma = jnp.ones((F,), jnp.float32)
    gamma_col = gamma.astype(jnp.float32).reshape(F, 1)

    if time_tile is not None:
        tt = int(time_tile)
        if tt != T and tt % 128 != 0:
            raise ValueError("time_tile must equal T or be a multiple of 128")

    x_item = jnp.dtype(x.dtype).itemsize
    o_item = jnp.dtype(out_dtype).itemsize
    if vmem_bytes is None:
        vmem_bytes = _query_vmem_bytes()
    target_block, vmem_cap = _gen_caps(int(vmem_bytes))

    use_batch_stats = training or (not track_running_stats) or (running_ma is None)

    if use_batch_stats:
        # Conservative footprint (possible double-buffered full blocks + f32 temps).
        footprint = B * F * T * (2 * x_item + 2 * o_item + 4) + (2 << 20)
        if time_tile is None and footprint <= int(0.7 * vmem_cap):
            # ---- single-HBM-read fast path: whole x resident in VMEM ----
            y, ma_col = pl.pallas_call(
                functools.partial(_small_fused_kernel,
                                  n_elems=float(B * T), eps=float(eps)),
                out_shape=(jax.ShapeDtypeStruct((B, F, T), out_dtype),
                           jax.ShapeDtypeStruct((F, 1), jnp.float32)),
                grid_spec=pltpu.PrefetchScalarGridSpec(
                    num_scalar_prefetch=0,
                    grid=(1,),
                    in_specs=[
                        pl.BlockSpec((B, F, T), lambda i: (0, 0, 0)),
                        pl.BlockSpec((F, 1), lambda i: (0, 0)),
                    ],
                    out_specs=[
                        pl.BlockSpec((B, F, T), lambda i: (0, 0, 0)),
                        pl.BlockSpec((F, 1), lambda i: (0, 0)),
                    ],
                ),
                compiler_params=pltpu.CompilerParams(
                    dimension_semantics=("arbitrary",),
                    vmem_limit_bytes=int(vmem_cap),
                ),
            )(x, gamma_col)
            ma = ma_col.reshape(F)
        else:
            # ---- streaming path: de-fused reduce + normalize ----
            ma = _run_abs_mean(x, time_tile=time_tile,
                               target_block=target_block, vmem_cap=vmem_cap)
            scale_col = gamma_col / (10.0 * (ma.reshape(F, 1) + eps))
            y = _run_normalize(x, scale_col, out_dtype=out_dtype,
                               compute_dtype=compute_dtype, time_tile=time_tile,
                               target_block=target_block, vmem_cap=vmem_cap)

        if training and track_running_stats and running_ma is not None:
            # running_ma.lerp_(ma, momentum): r <- r + momentum * (ma - r)
            new_running_ma = running_ma + momentum * (
                ma.astype(running_ma.dtype) - running_ma)
        else:
            new_running_ma = running_ma
    else:
        # Eval path: ma = running_ma; scale precomputed once in the wrapper.
        ma_col = running_ma.astype(jnp.float32).reshape(F, 1)
        scale_col = gamma_col / (10.0 * (ma_col + eps))
        y = _run_normalize(x, scale_col, out_dtype=out_dtype,
                           compute_dtype=compute_dtype, time_tile=time_tile,
                           target_block=target_block, vmem_cap=vmem_cap)
        new_running_ma = running_ma

    return y, new_running_ma


# --------------------------------------------------------------------------- #
# Pure-JAX references + self-test
# --------------------------------------------------------------------------- #
def _reference_train(x, gamma, running_ma, *, eps=1e-5, momentum=0.1):
    ma = jnp.mean(jnp.abs(x.astype(jnp.float32)), axis=(0, 2), keepdims=True)
    new_running_ma = running_ma + momentum * (ma.reshape(-1) - running_ma)
    scale = gamma.astype(jnp.float32)[None, :, None] / (10.0 * (ma + eps))
    return jnp.tanh(x.astype(jnp.float32) * scale).astype(x.dtype), new_running_ma


def _reference_eval(x, gamma, running_ma, *, eps=1e-5):
    ma = running_ma.astype(jnp.float32)[None, :, None]
    scale = gamma.astype(jnp.float32)[None, :, None] / (10.0 * (ma + eps))
    return jnp.tanh(x.astype(jnp.float32) * scale).astype(x.dtype)


if __name__ == "__main__":
    B, F, T = 2, 128, 384           # num_filters=128 (module default), small B/T
    key = jax.random.PRNGKey(0)
    x = jax.random.normal(key, (B, F, T), dtype=jnp.float32) * 3.0

    gamma = jnp.linspace(0.5, 1.5, F, dtype=jnp.float32)   # exercise scaling
    running_ma = jnp.ones((F,), dtype=jnp.float32)         # per reset_parameters()

    y_ref, rma_ref = _reference_train(x, gamma, running_ma)

    # 1) Train path, default sizing -> single-read VMEM-resident fast path.
    y, new_rma = phase_derivative_compressor(
        x, gamma, running_ma, eps=1e-5, momentum=0.1,
        training=True, track_running_stats=True)
    y = jax.block_until_ready(y)
    new_rma = jax.block_until_ready(new_rma)
    assert jnp.allclose(y, y_ref, atol=1e-5, rtol=1e-5), "fast-path output mismatch"
    assert jnp.allclose(new_rma, rma_ref, atol=1e-5, rtol=1e-5), "fast-path running_ma mismatch"

    # 2) Train path, forced streaming tiles -> de-fused reduce + normalize.
    y2, new_rma2 = phase_derivative_compressor(
        x, gamma, running_ma, eps=1e-5, momentum=0.1,
        training=True, track_running_stats=True, time_tile=128)
    y2 = jax.block_until_ready(y2)
    new_rma2 = jax.block_until_ready(new_rma2)
    assert jnp.allclose(y2, y_ref, atol=1e-5, rtol=1e-5), "streaming output mismatch"
    assert jnp.allclose(new_rma2, rma_ref, atol=1e-5, rtol=1e-5), "streaming running_ma mismatch"

    # 3) Eval path (uses running stats; normalize-only kernel).
    y_eval, rma_eval = phase_derivative_compressor(
        x, gamma, new_rma, eps=1e-5, momentum=0.1,
        training=False, track_running_stats=True)
    y_eval = jax.block_until_ready(y_eval)
    y_eval_ref = _reference_eval(x, gamma, new_rma)
    assert jnp.allclose(y_eval, y_eval_ref, atol=1e-5, rtol=1e-5), "eval output mismatch"
    assert jnp.allclose(rma_eval, new_rma), "eval must not update running_ma"

    print("KERNEL_OK")
</pallas_src>

<mosaic_0001>
module attributes {stable_mosaic.version = 11 : i64} {
  func.func @_small_fused_kernel(%arg0: i32, %arg1: memref<2x128x384xf32, #tpu.memory_space<vmem>>, %arg2: memref<128x1xf32, #tpu.memory_space<vmem>>, %arg3: memref<2x128x384xf32, #tpu.memory_space<vmem>>, %arg4: memref<128x1xf32, #tpu.memory_space<vmem>>) attributes {dimension_semantics = [#tpu.dimension_semantics<arbitrary>], iteration_bounds = array<i64: 1>, scalar_prefetch = 0 : i64, scratch_operands = 0 : i64, tpu.core_type = #tpu.core_type<tc>, window_params = [{pipeline_mode = #tpu.pipeline_mode<synchronous>, transform_indices = @transform_0, window_bounds = array<i64: 2, 128, 384>}, {pipeline_mode = #tpu.pipeline_mode<synchronous>, transform_indices = @transform_1, window_bounds = array<i64: 128, 1>}, {pipeline_mode = #tpu.pipeline_mode<synchronous>, transform_indices = @transform_2, window_bounds = array<i64: 2, 128, 384>}, {pipeline_mode = #tpu.pipeline_mode<synchronous>, transform_indices = @transform_3, window_bounds = array<i64: 128, 1>}]} {
    %c0 = arith.constant 0 : index
    %c0_0 = arith.constant 0 : index
    %c0_1 = arith.constant 0 : index
    %0 = vector.load %arg1[%c0, %c0_0, %c0_1] : memref<2x128x384xf32, #tpu.memory_space<vmem>>, vector<2x128x384xf32>
    %1 = math.absf %0 : vector<2x128x384xf32>
    %cst = arith.constant dense<0.000000e+00> : vector<128x384xf32>
    %2 = vector.multi_reduction <add>, %1, %cst [0] : vector<2x128x384xf32> to vector<128x384xf32>
    %cst_2 = arith.constant dense<0.000000e+00> : vector<128xf32>
    %3 = vector.multi_reduction <add>, %2, %cst_2 [1] : vector<128x384xf32> to vector<128xf32>
    %4 = vector.shape_cast %3 : vector<128xf32> to vector<128x1xf32>
    %cst_3 = arith.constant 7.680000e+02 : f32
    %5 = vector.broadcast %cst_3 : f32 to vector<128x1xf32>
    %6 = arith.divf %4, %5 : vector<128x1xf32>
    %c0_4 = arith.constant 0 : index
    %c0_5 = arith.constant 0 : index
    %7 = vector.load %arg2[%c0_4, %c0_5] : memref<128x1xf32, #tpu.memory_space<vmem>>, vector<128x1xf32>
    %cst_6 = arith.constant 9.99999974E-6 : f32
    %8 = vector.broadcast %cst_6 : f32 to vector<128x1xf32>
    %9 = arith.addf %6, %8 : vector<128x1xf32>
    %cst_7 = arith.constant 1.000000e+01 : f32
    %10 = vector.broadcast %cst_7 : f32 to vector<128x1xf32>
    %11 = arith.mulf %10, %9 : vector<128x1xf32>
    %12 = arith.divf %7, %11 : vector<128x1xf32>
    %13 = vector.shape_cast %12 : vector<128x1xf32> to vector<1x128x1xf32>
    %14 = vector.broadcast %13 : vector<1x128x1xf32> to vector<2x128x384xf32>
    %15 = arith.mulf %0, %14 : vector<2x128x384xf32>
    %16 = math.tanh %15 : vector<2x128x384xf32>
    %c0_8 = arith.constant 0 : index
    %c0_9 = arith.constant 0 : index
    %c0_10 = arith.constant 0 : index
    %17 = vector.load %arg3[%c0_8, %c0_9, %c0_10] : memref<2x128x384xf32, #tpu.memory_space<vmem>>, vector<2x128x384xf32>
    tpu.vector_store %arg3[%c0_8, %c0_9, %c0_10], %16 {strides = array<i32>} : memref<2x128x384xf32, #tpu.memory_space<vmem>>, vector<2x128x384xf32>,
    %c0_11 = arith.constant 0 : index
    %c0_12 = arith.constant 0 : index
    %18 = vector.load %arg4[%c0_11, %c0_12] : memref<128x1xf32, #tpu.memory_space<vmem>>, vector<128x1xf32>
    tpu.vector_store %arg4[%c0_11, %c0_12], %6 {strides = array<i32>} : memref<128x1xf32, #tpu.memory_space<vmem>>, vector<128x1xf32>,
    return
  }
  func.func @transform_0(%arg0: i32) -> (i32, i32, i32) {
    %c0_i32 = arith.constant 0 : i32
    %c0_i32_0 = arith.constant 0 : i32
    %c0_i32_1 = arith.constant 0 : i32
    %c0_i32_2 = arith.constant 0 : i32
    return %c0_i32, %c0_i32_0, %c0_i32_1 : i32, i32, i32
  }
  func.func @transform_1(%arg0: i32) -> (i32, i32) {
    %c0_i32 = arith.constant 0 : i32
    %c0_i32_0 = arith.constant 0 : i32
    %c0_i32_1 = arith.constant 0 : i32
    return %c0_i32, %c0_i32_0 : i32, i32
  }
  func.func @transform_2(%arg0: i32) -> (i32, i32, i32) {
    %c0_i32 = arith.constant 0 : i32
    %c0_i32_0 = arith.constant 0 : i32
    %c0_i32_1 = arith.constant 0 : i32
    %c0_i32_2 = arith.constant 0 : i32
    return %c0_i32, %c0_i32_0, %c0_i32_1 : i32, i32, i32
  }
  func.func @transform_3(%arg0: i32) -> (i32, i32) {
    %c0_i32 = arith.constant 0 : i32
    %c0_i32_0 = arith.constant 0 : i32
    %c0_i32_1 = arith.constant 0 : i32
    return %c0_i32, %c0_i32_0 : i32, i32
  }
}

</mosaic_0001>

<bundles_post_ra>
// kernel: tpu_custom_call.1
= control target key start
LH: loop header
LB: loop body
LE: loop exit
PB: predicated region body
PF: predicated region fallthrough
CT: control target
= control target key end

     0   :  { %9 = vsyncpa [#allocation3], 0  ;;  %s1539_s0 = inlined_call_operand.hbm [shape: f32[2,128,384], index: 0, kind: input, shape index: {}]   ;;  %s1540_s1 = inlined_call_operand.vmem [shape: f32[128,1], index: 1, kind: input, shape index: {}]   ;;  %s1541_s2 = inlined_call_operand.hbm [shape: f32[2,128,384], index: 2, kind: output, shape index: {0}]   ;;  %s1542_s3 = inlined_call_operand.vmem [shape: f32[128,1], index: 3, kind: output, shape index: {1}]  }
   0x1   :  { %10 = vsyncpa [#allocation4], 0  ;;  %s1156_s12 = smov [#allocation2]   ;;  %s1108_s16 = scalar_lea.hbm %s1539_s0, 12288 }
   0x2   :  { %s16_s13 = sshll.u32 %s1156_s12, 4  ;;  %p1109_p0 = scmp.ne.s32.totalorder %s1539_s0, %s1108_s16  ;;  %s17_s13 = int_to_ptr.vmem [resolvable:$true] %s16_s13 }
   0x3   :  { %p1112_p1 = scmp.lt.u32.totalorder %s1108_s16, %s1539_s0 }
   0x5   :  { %p1114_p2 = pnand %p1112_p1, %p1109_p0 }
   0x7   :  { %1117 = shalt.err (!%p1114_p2)
}
   0x8   :  { %s1118_s21 = scalar_lea.vmem %s17_s13, 12288  ;;  %p1123_p4 = scmp.lt.s32.totalorder %s17_s13, %s17_s13 }
   0x9   :  { %p1119_p3 = scmp.ne.s32.totalorder %s17_s13, %s1118_s21  ;;  %p1124_p5 = scmp.lt.s32.totalorder %s1118_s21, %s1118_s21 }
   0xb   :  { %p1125_p6 = por %p1124_p5, %p1123_p4 }
   0xd   :  { %p1126_p7 = pnand %p1125_p6, %p1119_p3 }
   0xf   :  { %1129 = shalt.err (!%p1126_p7)
}
  0x10   :  { %s1157_s22 = smov 384   ;;  %s1158_s23 = smov 24  }
  0x11   :  { %22 = dma.hbm_to_vmem [thread:$0]  %s1539_s0, 12288, %s17_s13, [#allocation3], %s1157_s22, %s1157_s22, %s1158_s23  }
  0x12   :  { %1152 = dma.done.wait [#allocation3], 12288  }
  0x13   :  { %1153 = vsyncadd [#allocation3], 4294955008  ;;  %v1196_v0 = vld [vmem:[#allocation2 + $0x30] sm:$0xff]  ;;  %v1198_v1 = vld [vmem:[#allocation2 + $0x38] sm:$0xff]  ;;  %vm797_vm0 = vcmask 7168  }
  0x14   :  { %v1200_v2 = vld [vmem:[#allocation2 + $0x40] sm:$0xff]  ;;  %v1202_v3 = vld [vmem:[#allocation2 + $0x1b0] sm:$0xff]  ;;  %v1204_v4 = vld [vmem:[#allocation2 + $0x1b8] sm:$0xff]  ;;  %v130_v6 = vand.u32 2147483647, %v1196_v0 }
  0x15   :  { %v1206_v5 = vld [vmem:[#allocation2 + $0x1c0] sm:$0xff]  ;;  %v131_v7 = vand.u32 2147483647, %v1198_v1  ;;  %v132_v8 = vand.u32 2147483647, %v1200_v2  ;;  %v1216_v13 = vld [vmem:[#allocation2 + $0x8] sm:$0xff] }
  0x16   :  { %v178_v9 = vand.u32 2147483647, %v1202_v3  ;;  %v179_v10 = vand.u32 2147483647, %v1204_v4  ;;  %v180_v11 = vand.u32 2147483647, %v1206_v5 }
  0x17   :  { %v1214_v12 = vld [vmem:[#allocation2] sm:$0xff]  ;;  %v1218_v15 = vld [vmem:[#allocation2 + $0x10] sm:$0xff]  ;;  %v1222_v17 = vld [vmem:[#allocation2 + $0x188] sm:$0xff]  ;;  %v125_v22 = vand.u32 2147483647, %v1216_v13 }
  0x18   :  { %v226_v14 = vadd.f32 %v178_v9, %v130_v6  ;;  %v1220_v16 = vld [vmem:[#allocation2 + $0x180] sm:$0xff]  ;;  %v124_v18 = vand.u32 2147483647, %v1214_v12  ;;  %v227_v19 = vadd.f32 %v179_v10, %v131_v7  ;;  %v228_v20 = vadd.f32 %v180_v11, %v132_v8  ;;  %v1225_v21 = vld [vmem:[#allocation2 + $0x190] sm:$0xff]  ;;  %v1229_v24 = vld [vmem:[#allocation2 + $0x48] sm:$0xff] }
  0x19   :  { %v126_v23 = vand.u32 2147483647, %v1218_v15  ;;  %v172_v25 = vand.u32 2147483647, %v1220_v16  ;;  %v173_v26 = vand.u32 2147483647, %v1222_v17 }
  0x1a   :  { %v174_v27 = vand.u32 2147483647, %v1225_v21  ;;  %v276_v28 = vadd.f32 %v227_v19, %v226_v14  ;;  %v1234_v29 = vld [vmem:[#allocation2 + $0x50] sm:$0xff]  ;;  %v1236_v30 = vld [vmem:[#allocation2 + $0x58] sm:$0xff]  ;;  %v1238_v31 = vld [vmem:[#allocation2 + $0x1c8] sm:$0xff] }
  0x1b   :  { %v133_v32 = vand.u32 2147483647, %v1229_v24  ;;  %v220_v33 = vadd.f32 %v172_v25, %v124_v18  ;;  %v221_v34 = vadd.f32 %v173_v26, %v125_v22  ;;  %v1241_v36 = vld [vmem:[#allocation2 + $0x1d0] sm:$0xff]  ;;  %v1243_v37 = vld [vmem:[#allocation2 + $0x1d8] sm:$0xff]  ;;  %v134_v38 = vand.u32 2147483647, %v1234_v29 }
  0x1c   :  { %v222_v35 = vadd.f32 %v174_v27, %v126_v23  ;;  %v1246_v39 = vld [vmem:[#allocation2 + $0x18] sm:$0xff]  ;;  %v277_v40 = vadd.f32 %v276_v28, %v228_v20  ;;  %v135_v41 = vand.u32 2147483647, %v1236_v30  ;;  %v181_v42 = vand.u32 2147483647, %v1238_v31  ;;  %v1252_v46 = vld [vmem:[#allocation2 + $0x20] sm:$0xff] }
  0x1d   :  { %v182_v43 = vand.u32 2147483647, %v1241_v36  ;;  %v268_v44 = vadd.f32 %v221_v34, %v220_v33  ;;  %v183_v45 = vand.u32 2147483647, %v1243_v37  ;;  %v1254_v47 = vld [vmem:[#allocation2 + $0x28] sm:$0xff]  ;;  %v1256_v48 = vld [vmem:[#allocation2 + $0x198] sm:$0xff] }
  0x1e   :  { %278 = vadd.xlane.f32.xlu1 %v277_v40  ;;  %v229_v49 = vadd.f32 %v181_v42, %v133_v32  ;;  %v1258_v51 = vld [vmem:[#allocation2 + $0x1a0] sm:$0xff]  ;;  %v1260_v52 = vld [vmem:[#allocation2 + $0x1a8] sm:$0xff]  ;;  %v127_v53 = vand.u32 2147483647, %v1246_v39  ;;  %v128_v54 = vand.u32 2147483647, %v1252_v46 }
  0x1f   :  { %v230_v50 = vadd.f32 %v182_v43, %v134_v38  ;;  %v269_v55 = vadd.f32 %v268_v44, %v222_v35  ;;  %v231_v56 = vadd.f32 %v183_v45, %v135_v41  ;;  %v129_v57 = vand.u32 2147483647, %v1254_v47  ;;  %v43_v59 = vld [vmem:[#allocation2 + $0x78] sm:$0xff]  ;;  %v44_v60 = vld [vmem:[#allocation2 + $0x80] sm:$0xff]  ;;  %v45_v6 = vld [vmem:[#allocation2 + $0x88] sm:$0xff] }
  0x20   :  { %v175_v58 = vand.u32 2147483647, %v1256_v48  ;;  %v176_v62 = vand.u32 2147483647, %v1258_v51  ;;  %v177_v63 = vand.u32 2147483647, %v1260_v52 }
  0x21   :  { %v280_v61 = vadd.f32 %v230_v50, %v229_v49  ;;  %v91_v7 = vld [vmem:[#allocation2 + $0x1f8] sm:$0xff]  ;;  %270 = vadd.xlane.f32.xlu0 %v269_v55  ;;  %v92_v9 = vld [vmem:[#allocation2 + $0x200] sm:$0xff]  ;;  %v93_v10 = vld [vmem:[#allocation2 + $0x208] sm:$0xff]  ;;  %v139_v11 = vand.u32 2147483647, %v43_v59 }
  0x22   :  { %v223_v8 = vadd.f32 %v175_v58, %v127_v53  ;;  %v140_v14 = vand.u32 2147483647, %v44_v60  ;;  %v224_v19 = vadd.f32 %v176_v62, %v128_v54  ;;  %v225_v20 = vadd.f32 %v177_v63, %v129_v57  ;;  %v49_v23 = vld [vmem:[#allocation2 + $0xa8] sm:$0xff]  ;;  %v50_v25 = vld [vmem:[#allocation2 + $0xb0] sm:$0xff]  ;;  %v51_v26 = vld [vmem:[#allocation2 + $0xb8] sm:$0xff] }
  0x23   :  { %v281_v18 = vadd.f32 %v280_v61, %v231_v56  ;;  %v141_v22 = vand.u32 2147483647, %v45_v6  ;;  %v187_v27 = vand.u32 2147483647, %v91_v7  ;;  %v188_v28 = vand.u32 2147483647, %v92_v9 }
  0x24   :  { %v189_v32 = vand.u32 2147483647, %v93_v10  ;;  %v272_v33 = vadd.f32 %v224_v19, %v223_v8  ;;  %v97_v34 = vld [vmem:[#allocation2 + $0x228] sm:$0xff]  ;;  %v98_v35 = vld [vmem:[#allocation2 + $0x230] sm:$0xff]  ;;  %v99_v38 = vld [vmem:[#allocation2 + $0x238] sm:$0xff] }
  0x25   :  { %282 = vadd.xlane.f32.xlu1 %v281_v18  ;;  %v145_v40 = vand.u32 2147483647, %v49_v23  ;;  %v235_v41 = vadd.f32 %v187_v27, %v139_v11  ;;  %v236_v42 = vadd.f32 %v188_v28, %v140_v14  ;;  %v146_v44 = vand.u32 2147483647, %v50_v25  ;;  %v1268_v45 = vld [vmem:[#allocation2 + $0xd8] sm:$0xff]  ;;  %v1270_v49 = vld [vmem:[#allocation2 + $0xe0] sm:$0xff] }
  0x26   :  { %v237_v43 = vadd.f32 %v189_v32, %v141_v22  ;;  %1567 = vst [vmem:[#allocation8_spill] sm:$0xff] %v1268_v45  ;;  %1568 = vst [vmem:[#allocation9_spill] sm:$0xff] %v1270_v49  ;;  %v1272_v50 = vld [vmem:[#allocation2 + $0xe8] sm:$0xff]  ;;  %v273_v53 = vadd.f32 %v272_v33, %v225_v20  ;;  %v147_v54 = vand.u32 2147483647, %v51_v26  ;;  %v1274_v59 = vld [vmem:[#allocation2 + $0x258] sm:$0xff] }
  0x27   :  { %1569 = vst [vmem:[#allocation10_spill] sm:$0xff] %v1272_v50  ;;  %v193_v55 = vand.u32 2147483647, %v97_v34  ;;  %v194_v56 = vand.u32 2147483647, %v98_v35  ;;  %v288_v57 = vadd.f32 %v236_v42, %v235_v41  ;;  %1570 = vst [vmem:[#allocation11_spill] sm:$0xff] %v1274_v59 }
  0x28   :  { %v195_v58 = vand.u32 2147483647, %v99_v38  ;;  %v1276_v60 = vld [vmem:[#allocation2 + $0x260] sm:$0xff]  ;;  %v1278_v61 = vld [vmem:[#allocation2 + $0x268] sm:$0xff]  ;;  %274 = vadd.xlane.f32.xlu0 %v273_v53  ;;  %v151_v6 = vand.u32 2147483647, %v1268_v45 }
  0x29   :  { %1571 = vst [vmem:[#allocation12_spill] sm:$0xff] %v1276_v60  ;;  %1572 = vst [vmem:[#allocation13_spill] sm:$0xff] %v1278_v61  ;;  %v241_v62 = vadd.f32 %v193_v55, %v145_v40  ;;  %v242_v63 = vadd.f32 %v194_v56, %v146_v44  ;;  %v152_v7 = vand.u32 2147483647, %v1270_v49  ;;  %v1282_v8 = vld [vmem:[#allocation2 + $0x60] sm:$0xff]  ;;  %v1284_v9 = vld [vmem:[#allocation2 + $0x68] sm:$0xff]  ;;  %v289_v10 = vadd.f32 %v288_v57, %v237_v43 }
  0x2a   :  { %v243_v11 = vadd.f32 %v195_v58, %v147_v54  ;;  %v153_v14 = vand.u32 2147483647, %v1272_v50  ;;  %v199_v18 = vand.u32 2147483647, %v1274_v59  ;;  %v1288_v19 = vld [vmem:[#allocation2 + $0x70] sm:$0xff]  ;;  %v1290_v20 = vld [vmem:[#allocation2 + $0x1e0] sm:$0xff] }
  0x2b   :  { %v296_v22 = vadd.f32 %v242_v63, %v241_v62  ;;  %v200_v23 = vand.u32 2147483647, %v1276_v60  ;;  %v201_v25 = vand.u32 2147483647, %v1278_v61  ;;  %v1294_v26 = vld [vmem:[#allocation2 + $0x1e8] sm:$0xff]  ;;  %v1296_v27 = vld [vmem:[#allocation2 + $0x1f0] sm:$0xff]  ;;  %290 = vadd.xlane.f32.xlu1 %v289_v10 }
  0x2c   :  { %v247_v28 = vadd.f32 %v199_v18, %v151_v6  ;;  %v136_v32 = vand.u32 2147483647, %v1282_v8  ;;  %v137_v33 = vand.u32 2147483647, %v1284_v9  ;;  %v138_v34 = vand.u32 2147483647, %v1288_v19 }
  0x2d   :  { %v297_v35 = vadd.f32 %v296_v22, %v243_v11  ;;  %v248_v38 = vadd.f32 %v200_v23, %v152_v7  ;;  %v249_v40 = vadd.f32 %v201_v25, %v153_v14  ;;  %v184_v41 = vand.u32 2147483647, %v1290_v20  ;;  %v1302_v42 = vld [vmem:[#allocation2 + $0x108] sm:$0xff]  ;;  %v1304_v43 = vld [vmem:[#allocation2 + $0x110] sm:$0xff]  ;;  %v1306_v44 = vld [vmem:[#allocation2 + $0x118] sm:$0xff] }
  0x2e   :  { %1573 = vst [vmem:[#allocation14_spill] sm:$0xff] %v1302_v42  ;;  %1574 = vst [vmem:[#allocation15_spill] sm:$0xff] %v1304_v43  ;;  %v185_v53 = vand.u32 2147483647, %v1294_v26  ;;  %v186_v54 = vand.u32 2147483647, %v1296_v27 }
  0x2f   :  { %1575 = vst [vmem:[#allocation16_spill] sm:$0xff] %v1306_v44  ;;  %v1310_v55 = vld [vmem:[#allocation2 + $0x288] sm:$0xff]  ;;  %v1312_v56 = vld [vmem:[#allocation2 + $0x290] sm:$0xff]  ;;  %v304_v57 = vadd.f32 %v248_v38, %v247_v28  ;;  %v232_v58 = vadd.f32 %v184_v41, %v136_v32  ;;  %v1314_v62 = vld [vmem:[#allocation2 + $0x298] sm:$0xff]  ;;  %v157_v63 = vand.u32 2147483647, %v1302_v42  ;;  %298 = vadd.xlane.f32.xlu1 %v297_v35 }
  0x30   :  { %1576 = vst [vmem:[#allocation17_spill] sm:$0xff] %v1310_v55  ;;  %1577 = vst [vmem:[#allocation18_spill] sm:$0xff] %v1312_v56  ;;  %v158_v6 = vand.u32 2147483647, %v1304_v43  ;;  %v1318_v7 = vld [vmem:[#allocation2 + $0x138] sm:$0xff]  ;;  %v233_v10 = vadd.f32 %v185_v53, %v137_v33  ;;  %v234_v11 = vadd.f32 %v186_v54, %v138_v34  ;;  %v1322_v22 = vld [vmem:[#allocation2 + $0x140] sm:$0xff] }
  0x31   :  { %1578 = vst [vmem:[#allocation19_spill] sm:$0xff] %v1314_v62  ;;  %1579 = vst [vmem:[#allocation20_spill] sm:$0xff] %v1318_v7  ;;  %v159_v14 = vand.u32 2147483647, %v1306_v44  ;;  %v205_v18 = vand.u32 2147483647, %v1310_v55  ;;  %v305_v25 = vadd.f32 %v304_v57, %v249_v40 }
  0x32   :  { %1580 = vst [vmem:[#allocation21_spill] sm:$0xff] %v1322_v22  ;;  %v1324_v23 = vld [vmem:[#allocation2 + $0x148] sm:$0xff]  ;;  %v206_v28 = vand.u32 2147483647, %v1312_v56  ;;  %v207_v32 = vand.u32 2147483647, %v1314_v62  ;;  %v284_v35 = vadd.f32 %v233_v10, %v232_v58 }
  0x33   :  { %1581 = vst [vmem:[#allocation22_spill] sm:$0xff] %v1324_v23  ;;  %v1328_v38 = vld [vmem:[#allocation2 + $0x2b8] sm:$0xff]  ;;  %v1330_v41 = vld [vmem:[#allocation2 + $0x2c0] sm:$0xff]  ;;  %v253_v33 = vadd.f32 %v205_v18, %v157_v63  ;;  %v1332_v34 = vld [vmem:[#allocation2 + $0x2c8] sm:$0xff]  ;;  %v163_v53 = vand.u32 2147483647, %v1318_v7  ;;  %306 = vadd.xlane.f32.xlu1 %v305_v25 }
  0x34   :  { %1582 = vst [vmem:[#allocation23_spill] sm:$0xff] %v1328_v38  ;;  %1583 = vst [vmem:[#allocation24_spill] sm:$0xff] %v1330_v41  ;;  %v164_v54 = vand.u32 2147483647, %v1322_v22  ;;  %v1336_v55 = vld [vmem:[#allocation2 + $0x90] sm:$0xff]  ;;  %v254_v44 = vadd.f32 %v206_v28, %v158_v6  ;;  %v255_v40 = vadd.f32 %v207_v32, %v159_v14  ;;  %v1340_v56 = vld [vmem:[#allocation2 + $0x98] sm:$0xff]  ;;  %v285_v58 = vadd.f32 %v284_v35, %v234_v11 }
  0x35   :  { %1584 = vst [vmem:[#allocation25_spill] sm:$0xff] %v1332_v34  ;;  %1585 = vst [vmem:[#allocation26_spill] sm:$0xff] %v1336_v55  ;;  %v165_v57 = vand.u32 2147483647, %v1324_v23  ;;  %v211_v62 = vand.u32 2147483647, %v1328_v38 }
  0x36   :  { %1586 = vst [vmem:[#allocation27_spill] sm:$0xff] %v1340_v56  ;;  %v1342_v43 = vld [vmem:[#allocation2 + $0xa0] sm:$0xff]  ;;  %v212_v63 = vand.u32 2147483647, %v1330_v41  ;;  %v213_v10 = vand.u32 2147483647, %v1332_v34  ;;  %v312_v6 = vadd.f32 %v254_v44, %v253_v33  ;;  %286 = vadd.xlane.f32.xlu0 %v285_v58 }
  0x37   :  { %1587 = vst [vmem:[#allocation28_spill] sm:$0xff] %v1342_v43  ;;  %v1346_v18 = vld [vmem:[#allocation2 + $0x210] sm:$0xff]  ;;  %v1348_v22 = vld [vmem:[#allocation2 + $0x218] sm:$0xff]  ;;  %v259_v14 = vadd.f32 %v211_v62, %v163_v53  ;;  %v1350_v28 = vld [vmem:[#allocation2 + $0x220] sm:$0xff]  ;;  %v142_v32 = vand.u32 2147483647, %v1336_v55 }
  0x38   :  { %1588 = vst [vmem:[#allocation29_spill] sm:$0xff] %v1346_v18  ;;  %1589 = vst [vmem:[#allocation30_spill] sm:$0xff] %v1348_v22  ;;  %v143_v38 = vand.u32 2147483647, %v1340_v56  ;;  %v73_v23 = vld [vmem:[#allocation2 + $0x168] sm:$0xff]  ;;  %v260_v25 = vadd.f32 %v212_v63, %v164_v54  ;;  %v261_v11 = vadd.f32 %v213_v10, %v165_v57  ;;  %v74_v41 = vld [vmem:[#allocation2 + $0x170] sm:$0xff]  ;;  %v313_v42 = vadd.f32 %v312_v6, %v255_v40 }
  0x39   :  { %1590 = vst [vmem:[#allocation31_spill] sm:$0xff] %v1350_v28  ;;  %v144_v35 = vand.u32 2147483647, %v1342_v43  ;;  %v190_v34 = vand.u32 2147483647, %v1346_v18  ;;  %v75_v7 = vld [vmem:[#allocation2 + $0x178] sm:$0xff] }
  0x3a   :  { %v191_v44 = vand.u32 2147483647, %v1348_v22  ;;  %v192_v62 = vand.u32 2147483647, %v1350_v28  ;;  %v121_v33 = vld [vmem:[#allocation2 + $0x2e8] sm:$0xff]  ;;  %v122_v53 = vld [vmem:[#allocation2 + $0x2f0] sm:$0xff]  ;;  %v320_v55 = vadd.f32 %v260_v25, %v259_v14  ;;  %314 = vadd.xlane.f32.xlu1 %v313_v42 }
  0x3b   :  { %v238_v61 = vadd.f32 %v190_v34, %v142_v32  ;;  %v123_v56 = vld [vmem:[#allocation2 + $0x2f8] sm:$0xff]  ;;  %v169_v60 = vand.u32 2147483647, %v73_v23  ;;  %v170_v58 = vand.u32 2147483647, %v74_v41  ;;  %v52_v54 = vld [vmem:[#allocation2 + $0xc0] sm:$0xff] }
  0x3c   :  { %v239_v57 = vadd.f32 %v191_v44, %v143_v38  ;;  %v240_v63 = vadd.f32 %v192_v62, %v144_v35  ;;  %v171_v10 = vand.u32 2147483647, %v75_v7  ;;  %v217_v18 = vand.u32 2147483647, %v121_v33  ;;  %v53_v43 = vld [vmem:[#allocation2 + $0xc8] sm:$0xff]  ;;  %v54_v59 = vld [vmem:[#allocation2 + $0xd0] sm:$0xff] }
  0x3d   :  { %v321_v40 = vadd.f32 %v320_v55, %v261_v11  ;;  %v218_v6 = vand.u32 2147483647, %v122_v53  ;;  %v219_v22 = vand.u32 2147483647, %v123_v56  ;;  %v100_v50 = vld [vmem:[#allocation2 + $0x240] sm:$0xff]  ;;  %v101_v28 = vld [vmem:[#allocation2 + $0x248] sm:$0xff] }
  0x3e   :  { %v292_v49 = vadd.f32 %v239_v57, %v238_v61  ;;  %v265_v45 = vadd.f32 %v217_v18, %v169_v60  ;;  %v102_v14 = vld [vmem:[#allocation2 + $0x250] sm:$0xff]  ;;  %v148_v34 = vand.u32 2147483647, %v52_v54  ;;  %v149_v32 = vand.u32 2147483647, %v53_v43  ;;  %v59_v35 = vld [vmem:[#allocation2 + $0xf8] sm:$0xff] }
  0x3f   :  { %v58_v23 = vld [vmem:[#allocation2 + $0xf0] sm:$0xff]  ;;  %v266_v41 = vadd.f32 %v218_v6, %v170_v58  ;;  %v267_v25 = vadd.f32 %v219_v22, %v171_v10  ;;  %v150_v42 = vand.u32 2147483647, %v54_v59  ;;  %v196_v38 = vand.u32 2147483647, %v100_v50  ;;  %v60_v7 = vld [vmem:[#allocation2 + $0x100] sm:$0xff]  ;;  %322 = vadd.xlane.f32.xlu1 %v321_v40 }
  0x40   :  { %v293_v44 = vadd.f32 %v292_v49, %v240_v63  ;;  %v197_v62 = vand.u32 2147483647, %v101_v28  ;;  %v198_v55 = vand.u32 2147483647, %v102_v14  ;;  %v106_v11 = vld [vmem:[#allocation2 + $0x270] sm:$0xff]  ;;  %v107_v56 = vld [vmem:[#allocation2 + $0x278] sm:$0xff] }
  0x41   :  { %v328_v33 = vadd.f32 %v266_v41, %v265_v45  ;;  %v244_v53 = vadd.f32 %v196_v38, %v148_v34  ;;  %v108_v61 = vld [vmem:[#allocation2 + $0x280] sm:$0xff]  ;;  %v154_v60 = vand.u32 2147483647, %v58_v23  ;;  %v155_v18 = vand.u32 2147483647, %v59_v35  ;;  %v65_v50 = vld [vmem:[#allocation2 + $0x128] sm:$0xff] }
  0x42   :  { %v64_v54 = vld [vmem:[#allocation2 + $0x120] sm:$0xff]  ;;  %294 = vadd.xlane.f32.xlu0 %v293_v44  ;;  %v245_v43 = vadd.f32 %v197_v62, %v149_v32  ;;  %v246_v58 = vadd.f32 %v198_v55, %v150_v42  ;;  %v156_v22 = vand.u32 2147483647, %v60_v7  ;;  %v202_v59 = vand.u32 2147483647, %v106_v11  ;;  %v66_v57 = vld [vmem:[#allocation2 + $0x130] sm:$0xff] }
  0x43   :  { %v329_v10 = vadd.f32 %v328_v33, %v267_v25  ;;  %v203_v40 = vand.u32 2147483647, %v107_v56  ;;  %v204_v49 = vand.u32 2147483647, %v108_v61  ;;  %v112_v28 = vld [vmem:[#allocation2 + $0x2a0] sm:$0xff]  ;;  %v113_v63 = vld [vmem:[#allocation2 + $0x2a8] sm:$0xff] }
  0x44   :  { %v300_v6 = vadd.f32 %v245_v43, %v244_v53  ;;  %v250_v14 = vadd.f32 %v202_v59, %v154_v60  ;;  %v114_v45 = vld [vmem:[#allocation2 + $0x2b0] sm:$0xff]  ;;  %v160_v34 = vand.u32 2147483647, %v64_v54  ;;  %v161_v41 = vand.u32 2147483647, %v65_v50  ;;  %v71_v7 = vld [vmem:[#allocation2 + $0x158] sm:$0xff] }
  0x45   :  { %v70_v23 = vld [vmem:[#allocation2 + $0x150] sm:$0xff]  ;;  %330 = vadd.xlane.f32.xlu1 %v329_v10  ;;  %v251_v38 = vadd.f32 %v203_v40, %v155_v18  ;;  %v252_v35 = vadd.f32 %v204_v49, %v156_v22  ;;  %v162_v32 = vand.u32 2147483647, %v66_v57  ;;  %v208_v42 = vand.u32 2147483647, %v112_v28  ;;  %v72_v44 = vld [vmem:[#allocation2 + $0x160] sm:$0xff] }
  0x46   :  { %v301_v62 = vadd.f32 %v300_v6, %v246_v58  ;;  %v209_v55 = vand.u32 2147483647, %v113_v63  ;;  %v210_v25 = vand.u32 2147483647, %v114_v45  ;;  %v118_v11 = vld [vmem:[#allocation2 + $0x2d0] sm:$0xff]  ;;  %v119_v56 = vld [vmem:[#allocation2 + $0x2d8] sm:$0xff] }
  0x47   :  { %v308_v33 = vadd.f32 %v251_v38, %v250_v14  ;;  %v256_v61 = vadd.f32 %v208_v42, %v160_v34  ;;  %v120_v53 = vld [vmem:[#allocation2 + $0x2e0] sm:$0xff]  ;;  %v166_v60 = vand.u32 2147483647, %v70_v23  ;;  %v167_v43 = vand.u32 2147483647, %v71_v7 }
  0x48   :  { %302 = vadd.xlane.f32.xlu0 %v301_v62  ;;  %v257_v54 = vadd.f32 %v209_v55, %v161_v41  ;;  %v258_v59 = vadd.f32 %v210_v25, %v162_v32  ;;  %v168_v50 = vand.u32 2147483647, %v72_v44  ;;  %v214_v18 = vand.u32 2147483647, %v118_v11 }
  0x49   :  { %v309_v22 = vadd.f32 %v308_v33, %v252_v35  ;;  %v215_v57 = vand.u32 2147483647, %v119_v56  ;;  %v216_v10 = vand.u32 2147483647, %v120_v53  ;;  %v1159_v58 = vmov 0  }
  0x4a   :  { %v316_v40 = vadd.f32 %v257_v54, %v256_v61  ;;  %v262_v49 = vadd.f32 %v214_v18, %v166_v60  ;;  %840 = vset.pattern.permute.xlu0 %v1159_v58  ;;  %841 = vset.pattern.permute.xlu1 %v1159_v58 }
  0x4b   :  { %v263_v28 = vadd.f32 %v215_v57, %v167_v43  ;;  %v264_v6 = vadd.f32 %v216_v10, %v168_v50 }
  0x4c   :  { %310 = vadd.xlane.f32.xlu0 %v309_v22  ;;  %v317_v63 = vadd.f32 %v316_v40, %v258_v59  ;;  %v349_v59 = vld [vmem:[%s1540_s1] sm:$0xff] }
  0x4d   :  { %v324_v14 = vadd.f32 %v263_v28, %v262_v49 }
  0x4f   :  { %v325_v45 = vadd.f32 %v324_v14, %v264_v6 }
  0x50   :  { %318 = vadd.xlane.f32.xlu0 %v317_v63  ;;  %v350_v63 = vld [vmem:[%s1540_s1 + $0x8] sm:$0xff] }
  0x54   :  { %326 = vadd.xlane.f32.xlu0 %v325_v45 }
  0xab   :  { %v279_v34 = vpop.xlane.xlu1 %278 }
  0xac   :  { %v335_v41 = vmul.f32 0.0013020834, %v279_v34 }
  0xae   :  { %800 = vst.msk [vmem:[%s1542_s3 + $0x10] sm:$0xff] %vm797_vm0, %v335_v41  ;;  %v271_v23 = vpop.xlane.xlu0 %270  ;;  %v367_v7 = vadd.f32 1e-05, %v335_v41 }
  0xaf   :  { %v333_v38 = vmul.f32 0.0013020834, %v271_v23 }
  0xb0   :  { %v383_v25 = vmul.f32 10.0, %v367_v7 }
  0xb1   :  { %v365_v35 = vadd.f32 1e-05, %v333_v38  ;;  %798 = vst.msk [vmem:[%s1542_s3] sm:$0xff] %vm797_vm0, %v333_v38  ;;  %v351_v38 = vld [vmem:[%s1540_s1 + $0x10] sm:$0xff] }
  0xb2   :  { %v283_v32 = vpop.xlane.xlu1 %282 }
  0xb3   :  { %v336_v42 = vmul.f32 0.0013020834, %v283_v32  ;;  %v381_v44 = vmul.f32 10.0, %v365_v35 }
  0xb5   :  { %801 = vst.msk [vmem:[%s1542_s3 + $0x18] sm:$0xff] %vm797_vm0, %v336_v42  ;;  %842 = vrcp.f32 %v381_v44  ;;  %v275_v62 = vpop.xlane.xlu0 %274  ;;  %v368_v11 = vadd.f32 1e-05, %v336_v42 }
  0xb6   :  { %v334_v55 = vmul.f32 0.0013020834, %v275_v62  ;;  %844 = vrcp.f32 %v383_v25 }
  0xb7   :  { %v384_v60 = vmul.f32 10.0, %v368_v11 }
  0xb8   :  { %v366_v56 = vadd.f32 1e-05, %v334_v55  ;;  %799 = vst.msk [vmem:[%s1542_s3 + $0x8] sm:$0xff] %vm797_vm0, %v334_v55  ;;  %v291_v33 = vpop.xlane.xlu1 %290 }
  0xb9   :  { %v338_v61 = vmul.f32 0.0013020834, %v291_v33 }
  0xba   :  { %v382_v53 = vmul.f32 10.0, %v366_v56  ;;  %v352_v56 = vld [vmem:[%s1540_s1 + $0x18] sm:$0xff] }
  0xbb   :  { %803 = vst.msk [vmem:[%s1542_s3 + $0x28] sm:$0xff] %vm797_vm0, %v338_v61  ;;  %v370_v18 = vadd.f32 1e-05, %v338_v61 }
  0xbc   :  { %846 = vrcp.f32 %v382_v53  ;;  %v299_v43 = vpop.xlane.xlu1 %298 }
  0xbd   :  { %v340_v54 = vmul.f32 0.0013020834, %v299_v43  ;;  %848 = vrcp.f32 %v384_v60  ;;  %v386_v28 = vmul.f32 10.0, %v370_v18 }
  0xbf   :  { %v843_v50 = vpop.eup %842  ;;  %805 = vst.msk [vmem:[%s1542_s3 + $0x38] sm:$0xff] %vm797_vm0, %v340_v54  ;;  %v372_v7 = vadd.f32 1e-05, %v340_v54 }
  0xc0   :  { %v307_v22 = vpop.xlane.xlu1 %306  ;;  %v398_v57 = vmul.f32 %v843_v50, %v349_v59  ;;  %v845_v6 = vpop.eup %844 }
  0xc1   :  { %v342_v10 = vmul.f32 0.0013020834, %v307_v22  ;;  %v402_v62 = vmul.f32 %v845_v6, %v351_v38  ;;  %v388_v60 = vmul.f32 10.0, %v372_v7  ;;  %v358_v22 = vld [vmem:[%s1540_s1 + $0x48] sm:$0xff]  ;;  %v360_v38 = vld [vmem:[%s1540_s1 + $0x58] sm:$0xff] }
  0xc2   :  { %431 = vperm.xlu0 %840, %v398_v57  }
  0xc3   :  { %v287_v40 = vpop.xlane.xlu0 %286  ;;  %v374_v49 = vadd.f32 1e-05, %v342_v10  ;;  %807 = vst.msk [vmem:[%s1542_s3 + $0x48] sm:$0xff] %vm797_vm0, %v342_v10 }
  0xc4   :  { %v337_v58 = vmul.f32 0.0013020834, %v287_v40 }
  0xc5   :  { %v390_v14 = vmul.f32 10.0, %v374_v49 }
  0xc6   :  { %v369_v45 = vadd.f32 1e-05, %v337_v58  ;;  %802 = vst.msk [vmem:[%s1542_s3 + $0x20] sm:$0xff] %vm797_vm0, %v337_v58  ;;  %v847_v41 = vpop.eup %846  ;;  %v353_v58 = vld [vmem:[%s1540_s1 + $0x20] sm:$0xff] }
  0xc7   :  { %v315_v34 = vpop.xlane.xlu1 %314  ;;  %850 = vrcp.f32 %v390_v14  ;;  %v400_v32 = vmul.f32 %v847_v41, %v350_v63  ;;  %v849_v55 = vpop.eup %848 }
  0xc8   :  { %v344_v23 = vmul.f32 0.0013020834, %v315_v34  ;;  %v385_v35 = vmul.f32 10.0, %v369_v45  ;;  %852 = vrcp.f32 %v386_v28  ;;  %v404_v43 = vmul.f32 %v849_v55, %v352_v56  ;;  %v354_v34 = vld [vmem:[%s1540_s1 + $0x28] sm:$0xff] }
  0xc9   :  { %436 = vperm.xlu1 %841, %v400_v32  }
  0xca   :  { %v376_v42 = vadd.f32 1e-05, %v344_v23  ;;  %809 = vst.msk [vmem:[%s1542_s3 + $0x58] sm:$0xff] %vm797_vm0, %v344_v23  ;;  %854 = vrcp.f32 %v385_v35 }
  0xcc   :  { %v323_v44 = vpop.xlane.xlu1 %322  ;;  %v392_v25 = vmul.f32 10.0, %v376_v42 }
  0xcd   :  { %v346_v11 = vmul.f32 0.0013020834, %v323_v44  ;;  %441 = vperm.xlu1 %841, %v402_v62  }
  0xce   :  { %856 = vrcp.f32 %v392_v25  ;;  %v362_v25 = vld [vmem:[%s1540_s1 + $0x68] sm:$0xff] }
  0xcf   :  { %v295_v33 = vpop.xlane.xlu0 %294  ;;  %v378_v61 = vadd.f32 1e-05, %v346_v11  ;;  %811 = vst.msk [vmem:[%s1542_s3 + $0x68] sm:$0xff] %vm797_vm0, %v346_v11 }
  0xd0   :  { %v339_v53 = vmul.f32 0.0013020834, %v295_v33 }
  0xd1   :  { %v394_v54 = vmul.f32 10.0, %v378_v61  ;;  %v851_v10 = vpop.eup %850  ;;  %446 = vperm.xlu1 %841, %v404_v43  }
  0xd2   :  { %v371_v59 = vadd.f32 1e-05, %v339_v53  ;;  %804 = vst.msk [vmem:[%s1542_s3 + $0x30] sm:$0xff] %vm797_vm0, %v339_v53  ;;  %v331_v50 = vpop.xlane.xlu1 %330  ;;  %v853_v28 = vpop.eup %852  ;;  %v416_v6 = vmul.f32 %v851_v10, %v358_v22  ;;  %v355_v53 = vld [vmem:[%s1540_s1 + $0x30] sm:$0xff] }
  0xd3   :  { %v348_v18 = vmul.f32 0.0013020834, %v331_v50  ;;  %858 = vrcp.f32 %v394_v54  ;;  %v408_v44 = vmul.f32 %v853_v28, %v354_v34  ;;  %v356_v50 = vld [vmem:[%s1540_s1 + $0x38] sm:$0xff] }
  0xd4   :  { %v387_v57 = vmul.f32 10.0, %v371_v59  ;;  %860 = vrcp.f32 %v388_v60  ;;  %v855_v14 = vpop.eup %854  ;;  %476 = vperm.xlu0 %840, %v416_v6   ;;  %v357_v6 = vld [vmem:[%s1540_s1 + $0x40] sm:$0xff] }
  0xd5   :  { %v380_v40 = vadd.f32 1e-05, %v348_v18  ;;  %813 = vst.msk [vmem:[%s1542_s3 + $0x78] sm:$0xff] %vm797_vm0, %v348_v18  ;;  %v303_v49 = vpop.xlane.xlu0 %302  ;;  %v406_v23 = vmul.f32 %v855_v14, %v353_v58 }
  0xd6   :  { %862 = vrcp.f32 %v387_v57  ;;  %v341_v63 = vmul.f32 0.0013020834, %v303_v49  ;;  %v364_v57 = vld [vmem:[%s1540_s1 + $0x78] sm:$0xff] }
  0xd7   :  { %v396_v45 = vmul.f32 10.0, %v380_v40  ;;  %451 = vperm.xlu1 %841, %v406_v23  }
  0xd8   :  { %v373_v41 = vadd.f32 1e-05, %v341_v63  ;;  %806 = vst.msk [vmem:[%s1542_s3 + $0x40] sm:$0xff] %vm797_vm0, %v341_v63  ;;  %v857_v32 = vpop.eup %856 }
  0xd9   :  { %864 = vrcp.f32 %v396_v45  ;;  %v311_v35 = vpop.xlane.xlu0 %310  ;;  %v420_v62 = vmul.f32 %v857_v32, %v360_v38 }
  0xda   :  { %v389_v42 = vmul.f32 10.0, %v373_v41  ;;  %v343_v7 = vmul.f32 0.0013020834, %v311_v35  ;;  %v359_v41 = vld [vmem:[%s1540_s1 + $0x50] sm:$0xff]  ;;  %v361_v35 = vld [vmem:[%s1540_s1 + $0x60] sm:$0xff] }
  0xdb   :  { %486 = vperm.xlu0 %840, %v420_v62   ;;  %456 = vperm.xlu1 %841, %v408_v44  }
  0xdc   :  { %866 = vrcp.f32 %v389_v42  ;;  %v375_v55 = vadd.f32 1e-05, %v343_v7  ;;  %808 = vst.msk [vmem:[%s1542_s3 + $0x50] sm:$0xff] %vm797_vm0, %v343_v7  ;;  %v363_v7 = vld [vmem:[%s1540_s1 + $0x70] sm:$0xff]  ;;  %s1160_s1 = smov [#allocation5]  }
  0xdd   :  { %v319_v11 = vpop.xlane.xlu0 %318  ;;  %v859_v56 = vpop.eup %858  ;;  %s819_s9 = sshll.u32 %s1160_s1, 4  ;;  %s820_s9 = int_to_ptr.vmem [resolvable:$true] %s819_s9 }
  0xde   :  { %v391_v33 = vmul.f32 10.0, %v375_v55  ;;  %v345_v61 = vmul.f32 0.0013020834, %v319_v11  ;;  %v861_v60 = vpop.eup %860  ;;  %v424_v43 = vmul.f32 %v859_v56, %v362_v25  ;;  %s1130_s10 = scalar_lea.vmem %s820_s9, 12288  ;;  %p1135_p9 = scmp.lt.s32.totalorder %s820_s9, %s820_s9 }
  0xdf   :  { %v412_v58 = vmul.f32 %v861_v60, %v356_v50  ;;  %p1131_p8 = scmp.ne.s32.totalorder %s820_s9, %s1130_s10  ;;  %p1136_p10 = scmp.lt.s32.totalorder %s1130_s10, %s1130_s10 }
  0xe0   :  { %v863_v54 = vpop.eup %862  ;;  %868 = vrcp.f32 %v391_v33  ;;  %v377_v59 = vadd.f32 1e-05, %v345_v61  ;;  %810 = vst.msk [vmem:[%s1542_s3 + $0x60] sm:$0xff] %vm797_vm0, %v345_v61  ;;  %496 = vperm.xlu0 %840, %v424_v43  }
  0xe1   :  { %v410_v18 = vmul.f32 %v863_v54, %v355_v53  ;;  %v327_v22 = vpop.xlane.xlu0 %326  ;;  %p1137_p11 = por %p1136_p10, %p1135_p9 }
  0xe2   :  { %v393_v10 = vmul.f32 10.0, %v377_v59  ;;  %v347_v40 = vmul.f32 0.0013020834, %v327_v22 }
  0xe3   :  { %v865_v49 = vpop.eup %864  ;;  %461 = vperm.xlu1 %841, %v410_v18   ;;  %p1138_p12 = pnand %p1137_p11, %p1131_p8 }
  0xe4   :  { %870 = vrcp.f32 %v393_v10  ;;  %v379_v28 = vadd.f32 1e-05, %v347_v40  ;;  %812 = vst.msk [vmem:[%s1542_s3 + $0x70] sm:$0xff] %vm797_vm0, %v347_v40  ;;  %v428_v63 = vmul.f32 %v865_v49, %v364_v57 }
  0xe6   :  { %v867_v14 = vpop.eup %866  ;;  %v395_v45 = vmul.f32 10.0, %v379_v28  ;;  %506 = vperm.xlu0 %840, %v428_v63  }
  0xe7   :  { %466 = vperm.xlu1 %841, %v412_v58   ;;  %v414_v34 = vmul.f32 %v867_v14, %v357_v6 }
  0xe8   :  { %872 = vrcp.f32 %v395_v45 }
  0xea   :  { %v869_v23 = vpop.eup %868 }
  0xeb   :  { %471 = vperm.xlu1 %841, %v414_v34   ;;  %v418_v38 = vmul.f32 %v869_v23, %v359_v41 }
  0xee   :  { %v871_v32 = vpop.eup %870 }
  0xef   :  { %481 = vperm.xlu1 %841, %v418_v38   ;;  %v422_v42 = vmul.f32 %v871_v32, %v361_v35 }
  0xf2   :  { %v873_v44 = vpop.eup %872 }
  0xf3   :  { %491 = vperm.xlu1 %841, %v422_v42   ;;  %v426_v62 = vmul.f32 %v873_v44, %v363_v7 }
  0xf7   :  { %501 = vperm.xlu1 %841, %v426_v62  }
 0x141   :  { %v432_v55 = vpop.permute.xlu0 %431 }
 0x142   :  { %v509_v25 = vmul.f32 %v432_v55, %v1214_v12  ;;  %v510_v11 = vmul.f32 %v432_v55, %v1216_v13  ;;  %v511_v56 = vmul.f32 %v432_v55, %v1218_v15  ;;  %v557_v33 = vmul.f32 %v432_v55, %v1220_v16 }
 0x143   :  { %v558_v61 = vmul.f32 %v432_v55, %v1222_v17  ;;  %v559_v53 = vmul.f32 %v432_v55, %v1225_v21 }
 0x144   :  { %874 = vtanh.f32 %v509_v25 }
 0x145   :  { %876 = vtanh.f32 %v510_v11  ;;  %v1595_v11 = vld [vmem:[#allocation12_spill] sm:$0xff] }
 0x146   :  { %878 = vtanh.f32 %v511_v56 }
 0x147   :  { %880 = vtanh.f32 %v557_v33 }
 0x148   :  { %882 = vtanh.f32 %v558_v61  ;;  %v437_v60 = vpop.permute.xlu1 %436  ;;  %v1596_v61 = vld [vmem:[#allocation13_spill] sm:$0xff] }
 0x149   :  { %884 = vtanh.f32 %v559_v53  ;;  %v512_v43 = vmul.f32 %v437_v60, %v1246_v39  ;;  %v513_v12 = vmul.f32 %v437_v60, %v1252_v46  ;;  %v514_v13 = vmul.f32 %v437_v60, %v1254_v47 }
 0x14a   :  { %v560_v15 = vmul.f32 %v437_v60, %v1256_v48  ;;  %v561_v16 = vmul.f32 %v437_v60, %v1258_v51  ;;  %v562_v17 = vmul.f32 %v437_v60, %v1260_v52 }
 0x14b   :  { %886 = vtanh.f32 %v512_v43  ;;  %v1066_v43 = vld [vmem:[#allocation2 + $0x78] sm:$0xff] }
 0x14c   :  { %888 = vtanh.f32 %v513_v12  ;;  %v442_v21 = vpop.permute.xlu1 %441 }
 0x14d   :  { %890 = vtanh.f32 %v514_v13  ;;  %v515_v54 = vmul.f32 %v442_v21, %v1196_v0  ;;  %v516_v39 = vmul.f32 %v442_v21, %v1198_v1  ;;  %v517_v46 = vmul.f32 %v442_v21, %v1200_v2 }
 0x14e   :  { %v875_v59 = vpop.eup %874  ;;  %892 = vtanh.f32 %v560_v15  ;;  %v563_v48 = vmul.f32 %v442_v21, %v1202_v3  ;;  %v564_v18 = vmul.f32 %v442_v21, %v1204_v4  ;;  %v565_v1 = vmul.f32 %v442_v21, %v1206_v5  ;;  %v1067_v15 = vld [vmem:[#allocation2 + $0x80] sm:$0xff]  ;;  %v1068_v21 = vld [vmem:[#allocation2 + $0x88] sm:$0xff] }
 0x14f   :  { %v877_v50 = vpop.eup %876  ;;  %701 = vst [vmem:[#allocation5] sm:$0xff] %v875_v59  ;;  %894 = vtanh.f32 %v561_v16 }
 0x150   :  { %v879_v47 = vpop.eup %878  ;;  %702 = vst [vmem:[#allocation5 + $0x8] sm:$0xff] %v877_v50  ;;  %896 = vtanh.f32 %v562_v17  ;;  %v447_v51 = vpop.permute.xlu1 %446 }
 0x151   :  { %v881_v52 = vpop.eup %880  ;;  %703 = vst [vmem:[#allocation5 + $0x10] sm:$0xff] %v879_v47  ;;  %898 = vtanh.f32 %v515_v54  ;;  %v518_v2 = vmul.f32 %v447_v51, %v1229_v24  ;;  %v519_v3 = vmul.f32 %v447_v51, %v1234_v29  ;;  %v520_v10 = vmul.f32 %v447_v51, %v1236_v30  ;;  %v1070_v47 = vld [vmem:[#allocation2 + $0x200] sm:$0xff] }
 0x152   :  { %v883_v0 = vpop.eup %882  ;;  %749 = vst [vmem:[#allocation5 + $0x180] sm:$0xff] %v881_v52  ;;  %900 = vtanh.f32 %v516_v39  ;;  %v566_v40 = vmul.f32 %v447_v51, %v1238_v31  ;;  %v567_v58 = vmul.f32 %v447_v51, %v1241_v36  ;;  %v568_v28 = vmul.f32 %v447_v51, %v1243_v37  ;;  %v1069_v39 = vld [vmem:[#allocation2 + $0x1f8] sm:$0xff]  ;;  %v1071_v52 = vld [vmem:[#allocation2 + $0x208] sm:$0xff] }
 0x153   :  { %v885_v22 = vpop.eup %884  ;;  %750 = vst [vmem:[#allocation5 + $0x188] sm:$0xff] %v883_v0  ;;  %902 = vtanh.f32 %v517_v46 }
 0x154   :  { %751 = vst [vmem:[#allocation5 + $0x190] sm:$0xff] %v885_v22  ;;  %904 = vtanh.f32 %v563_v48  ;;  %v1597_v22 = vld [vmem:[#allocation14_spill] sm:$0xff] }
 0x155   :  { %v887_v57 = vpop.eup %886  ;;  %906 = vtanh.f32 %v564_v18 }
 0x156   :  { %v889_v4 = vpop.eup %888  ;;  %704 = vst [vmem:[#allocation5 + $0x18] sm:$0xff] %v887_v57  ;;  %908 = vtanh.f32 %v565_v1  ;;  %v452_v5 = vpop.permute.xlu1 %451  ;;  %v1598_v57 = vld [vmem:[#allocation15_spill] sm:$0xff] }
 0x157   :  { %v891_v49 = vpop.eup %890  ;;  %705 = vst [vmem:[#allocation5 + $0x20] sm:$0xff] %v889_v4  ;;  %910 = vtanh.f32 %v518_v2  ;;  %v521_v30 = vmul.f32 %v452_v5, %v1282_v8  ;;  %v522_v31 = vmul.f32 %v452_v5, %v1284_v9  ;;  %v523_v36 = vmul.f32 %v452_v5, %v1288_v19  ;;  %v477_v9 = vpop.permute.xlu0 %476  ;;  %v1591_v19 = vld [vmem:[#allocation8_spill] sm:$0xff] }
 0x158   :  { %v893_v24 = vpop.eup %892  ;;  %706 = vst [vmem:[#allocation5 + $0x28] sm:$0xff] %v891_v49  ;;  %912 = vtanh.f32 %v519_v3  ;;  %v569_v37 = vmul.f32 %v452_v5, %v1290_v20  ;;  %v570_v34 = vmul.f32 %v452_v5, %v1294_v26  ;;  %v571_v41 = vmul.f32 %v452_v5, %v1296_v27  ;;  %v1592_v20 = vld [vmem:[#allocation9_spill] sm:$0xff]  ;;  %v1593_v26 = vld [vmem:[#allocation10_spill] sm:$0xff]  ;;  %v1594_v27 = vld [vmem:[#allocation11_spill] sm:$0xff] }
 0x159   :  { %v895_v29 = vpop.eup %894  ;;  %752 = vst [vmem:[#allocation5 + $0x198] sm:$0xff] %v893_v24  ;;  %914 = vtanh.f32 %v520_v10  ;;  %v536_v38 = vmul.f32 %v477_v9, %v1591_v19  ;;  %v537_v32 = vmul.f32 %v477_v9, %v1592_v20  ;;  %v538_v7 = vmul.f32 %v477_v9, %v1593_v26 }
 0x15a   :  { %v897_v63 = vpop.eup %896  ;;  %753 = vst [vmem:[#allocation5 + $0x1a0] sm:$0xff] %v895_v29  ;;  %916 = vtanh.f32 %v566_v40  ;;  %v584_v62 = vmul.f32 %v477_v9, %v1594_v27  ;;  %v457_v55 = vpop.permute.xlu1 %456  ;;  %v585_v56 = vmul.f32 %v477_v9, %v1595_v11  ;;  %v586_v53 = vmul.f32 %v477_v9, %v1596_v61  ;;  %v1599_v40 = vld [vmem:[#allocation16_spill] sm:$0xff] }
 0x15b   :  { %v899_v6 = vpop.eup %898  ;;  %754 = vst [vmem:[#allocation5 + $0x1a8] sm:$0xff] %v897_v63  ;;  %918 = vtanh.f32 %v567_v58  ;;  %v524_v12 = vmul.f32 %v1066_v43, %v457_v55  ;;  %v525_v16 = vmul.f32 %v1067_v15, %v457_v55  ;;  %v526_v54 = vmul.f32 %v1068_v21, %v457_v55  ;;  %v487_v0 = vpop.permute.xlu0 %486  ;;  %v1600_v58 = vld [vmem:[#allocation17_spill] sm:$0xff]  ;;  %v1613_v21 = vld [vmem:[#allocation24_spill] sm:$0xff] }
 0x15c   :  { %v901_v14 = vpop.eup %900  ;;  %707 = vst [vmem:[#allocation5 + $0x30] sm:$0xff] %v899_v6  ;;  %920 = vtanh.f32 %v568_v28  ;;  %v572_v50 = vmul.f32 %v1069_v39, %v457_v55  ;;  %v573_v48 = vmul.f32 %v1070_v47, %v457_v55  ;;  %v574_v18 = vmul.f32 %v1071_v52, %v457_v55  ;;  %v1602_v6 = vld [vmem:[#allocation19_spill] sm:$0xff]  ;;  %v1614_v39 = vld [vmem:[#allocation25_spill] sm:$0xff]  ;;  %v1073_v52 = vld [vmem:[#allocation2 + $0xb0] sm:$0xff] }
 0x15d   :  { %v903_v45 = vpop.eup %902  ;;  %708 = vst [vmem:[#allocation5 + $0x38] sm:$0xff] %v901_v14  ;;  %922 = vtanh.f32 %v521_v30  ;;  %v542_v2 = vmul.f32 %v487_v0, %v1597_v22  ;;  %v543_v10 = vmul.f32 %v487_v0, %v1598_v57  ;;  %v544_v5 = vmul.f32 %v487_v0, %v1599_v40  ;;  %v1601_v30 = vld [vmem:[#allocation18_spill] sm:$0xff]  ;;  %v1072_v47 = vld [vmem:[#allocation2 + $0xa8] sm:$0xff] }
 0x15e   :  { %v905_v8 = vpop.eup %904  ;;  %709 = vst [vmem:[#allocation5 + $0x40] sm:$0xff] %v903_v45  ;;  %924 = vtanh.f32 %v522_v31  ;;  %v590_v24 = vmul.f32 %v487_v0, %v1600_v58  ;;  %v591_v63 = vmul.f32 %v487_v0, %v1601_v30  ;;  %v1076_v40 = vld [vmem:[#allocation2 + $0x230] sm:$0xff]  ;;  %v1077_v58 = vld [vmem:[#allocation2 + $0x238] sm:$0xff] }
 0x15f   :  { %v907_v23 = vpop.eup %906  ;;  %755 = vst [vmem:[#allocation5 + $0x1b0] sm:$0xff] %v905_v8  ;;  %926 = vtanh.f32 %v523_v36  ;;  %v592_v36 = vmul.f32 %v487_v0, %v1602_v6  ;;  %v1604_v8 = vld [vmem:[#allocation27_spill] sm:$0xff] }
 0x160   :  { %v909_v35 = vpop.eup %908  ;;  %756 = vst [vmem:[#allocation5 + $0x1b8] sm:$0xff] %v907_v23  ;;  %928 = vtanh.f32 %v569_v37  ;;  %v1603_v37 = vld [vmem:[#allocation26_spill] sm:$0xff]  ;;  %v1605_v23 = vld [vmem:[#allocation28_spill] sm:$0xff] }
 0x161   :  { %v911_v42 = vpop.eup %910  ;;  %757 = vst [vmem:[#allocation5 + $0x1c0] sm:$0xff] %v909_v35  ;;  %930 = vtanh.f32 %v570_v34  ;;  %v1606_v35 = vld [vmem:[#allocation29_spill] sm:$0xff] }
 0x162   :  { %v913_v44 = vpop.eup %912  ;;  %710 = vst [vmem:[#allocation5 + $0x48] sm:$0xff] %v911_v42  ;;  %932 = vtanh.f32 %v571_v41  ;;  %v462_v28 = vpop.permute.xlu1 %461  ;;  %v1607_v42 = vld [vmem:[#allocation30_spill] sm:$0xff] }
 0x163   :  { %v915_v25 = vpop.eup %914  ;;  %711 = vst [vmem:[#allocation5 + $0x50] sm:$0xff] %v913_v44  ;;  %934 = vtanh.f32 %v536_v38  ;;  %v527_v45 = vmul.f32 %v462_v28, %v1603_v37  ;;  %v528_v41 = vmul.f32 %v462_v28, %v1604_v8  ;;  %v529_v19 = vmul.f32 %v462_v28, %v1605_v23  ;;  %v1608_v44 = vld [vmem:[#allocation31_spill] sm:$0xff]  ;;  %v1082_v23 = vld [vmem:[#allocation2 + $0x2f0] sm:$0xff] }
 0x164   :  { %v917_v33 = vpop.eup %916  ;;  %712 = vst [vmem:[#allocation5 + $0x58] sm:$0xff] %v915_v25  ;;  %936 = vtanh.f32 %v537_v32  ;;  %v575_v20 = vmul.f32 %v462_v28, %v1606_v35  ;;  %v576_v26 = vmul.f32 %v462_v28, %v1607_v42  ;;  %v577_v27 = vmul.f32 %v462_v28, %v1608_v44  ;;  %v1609_v25 = vld [vmem:[#allocation20_spill] sm:$0xff]  ;;  %v1083_v35 = vld [vmem:[#allocation2 + $0x2f8] sm:$0xff]  ;;  %v1085_v44 = vld [vmem:[#allocation2 + $0xc8] sm:$0xff] }
 0x165   :  { %v919_v60 = vpop.eup %918  ;;  %758 = vst [vmem:[#allocation5 + $0x1c8] sm:$0xff] %v917_v33  ;;  %938 = vtanh.f32 %v538_v7  ;;  %v1610_v33 = vld [vmem:[#allocation21_spill] sm:$0xff]  ;;  %v1084_v42 = vld [vmem:[#allocation2 + $0xc0] sm:$0xff] }
 0x166   :  { %v921_v13 = vpop.eup %920  ;;  %759 = vst [vmem:[#allocation5 + $0x1d0] sm:$0xff] %v919_v60  ;;  %940 = vtanh.f32 %v584_v62  ;;  %v497_v62 = vpop.permute.xlu0 %496  ;;  %v1611_v60 = vld [vmem:[#allocation22_spill] sm:$0xff] }
 0x167   :  { %v923_v17 = vpop.eup %922  ;;  %760 = vst [vmem:[#allocation5 + $0x1d8] sm:$0xff] %v921_v13  ;;  %942 = vtanh.f32 %v585_v56  ;;  %v548_v11 = vmul.f32 %v497_v62, %v1609_v25  ;;  %v549_v61 = vmul.f32 %v497_v62, %v1610_v33  ;;  %v550_v43 = vmul.f32 %v497_v62, %v1611_v60  ;;  %v1612_v13 = vld [vmem:[#allocation23_spill] sm:$0xff]  ;;  %v1088_v60 = vld [vmem:[#allocation2 + $0x248] sm:$0xff] }
 0x168   :  { %v925_v59 = vpop.eup %924  ;;  %713 = vst [vmem:[#allocation5 + $0x60] sm:$0xff] %v923_v17  ;;  %944 = vtanh.f32 %v586_v53  ;;  %v596_v15 = vmul.f32 %v497_v62, %v1612_v13  ;;  %v1089_v13 = vld [vmem:[#allocation2 + $0x250] sm:$0xff] }
 0x169   :  { %v927_v46 = vpop.eup %926  ;;  %714 = vst [vmem:[#allocation5 + $0x68] sm:$0xff] %v925_v59  ;;  %946 = vtanh.f32 %v524_v12 }
 0x16a   :  { %v929_v51 = vpop.eup %928  ;;  %715 = vst [vmem:[#allocation5 + $0x70] sm:$0xff] %v927_v46  ;;  %948 = vtanh.f32 %v525_v16  ;;  %v467_v16 = vpop.permute.xlu1 %466 }
 0x16b   :  { %v931_v1 = vpop.eup %930  ;;  %761 = vst [vmem:[#allocation5 + $0x1e0] sm:$0xff] %v929_v51  ;;  %950 = vtanh.f32 %v526_v54  ;;  %v597_v54 = vmul.f32 %v497_v62, %v1613_v21 }
 0x16c   :  { %v933_v3 = vpop.eup %932  ;;  %762 = vst [vmem:[#allocation5 + $0x1e8] sm:$0xff] %v931_v1  ;;  %952 = vtanh.f32 %v572_v50  ;;  %v598_v50 = vmul.f32 %v497_v62, %v1614_v39  ;;  %v1074_v1 = vld [vmem:[#allocation2 + $0xb8] sm:$0xff] }
 0x16d   :  { %v935_v4 = vpop.eup %934  ;;  %763 = vst [vmem:[#allocation5 + $0x1f0] sm:$0xff] %v933_v3  ;;  %954 = vtanh.f32 %v573_v48  ;;  %v530_v48 = vmul.f32 %v1072_v47, %v467_v16  ;;  %v532_v22 = vmul.f32 %v1074_v1, %v467_v16  ;;  %v1075_v3 = vld [vmem:[#allocation2 + $0x228] sm:$0xff]  ;;  %v1094_v1 = vld [vmem:[#allocation2 + $0x278] sm:$0xff] }
 0x16e   :  { %v937_v49 = vpop.eup %936  ;;  %728 = vst [vmem:[#allocation5 + $0xd8] sm:$0xff] %v935_v4  ;;  %956 = vtanh.f32 %v574_v18  ;;  %v531_v18 = vmul.f32 %v1073_v52, %v467_v16  ;;  %v578_v57 = vmul.f32 %v1075_v3, %v467_v16  ;;  %v1095_v3 = vld [vmem:[#allocation2 + $0x280] sm:$0xff] }
 0x16f   :  { %v939_v29 = vpop.eup %938  ;;  %729 = vst [vmem:[#allocation5 + $0xe0] sm:$0xff] %v937_v49  ;;  %958 = vtanh.f32 %v542_v2 }
 0x170   :  { %v941_v31 = vpop.eup %940  ;;  %730 = vst [vmem:[#allocation5 + $0xe8] sm:$0xff] %v939_v29  ;;  %960 = vtanh.f32 %v543_v10  ;;  %v507_v10 = vpop.permute.xlu0 %506  ;;  %v1078_v29 = vld [vmem:[#allocation2 + $0x168] sm:$0xff] }
 0x171   :  { %v943_v14 = vpop.eup %942  ;;  %776 = vst [vmem:[#allocation5 + $0x258] sm:$0xff] %v941_v31  ;;  %962 = vtanh.f32 %v544_v5  ;;  %v579_v5 = vmul.f32 %v1076_v40, %v467_v16  ;;  %v554_v30 = vmul.f32 %v1078_v29, %v507_v10  ;;  %v1079_v31 = vld [vmem:[#allocation2 + $0x170] sm:$0xff] }
 0x172   :  { %v945_v34 = vpop.eup %944  ;;  %777 = vst [vmem:[#allocation5 + $0x260] sm:$0xff] %v943_v14  ;;  %964 = vtanh.f32 %v590_v24  ;;  %v580_v24 = vmul.f32 %v1077_v58, %v467_v16  ;;  %v555_v6 = vmul.f32 %v1079_v31, %v507_v10  ;;  %v1080_v14 = vld [vmem:[#allocation2 + $0x178] sm:$0xff] }
 0x173   :  { %v947_v9 = vpop.eup %946  ;;  %778 = vst [vmem:[#allocation5 + $0x268] sm:$0xff] %v945_v34  ;;  %966 = vtanh.f32 %v591_v63  ;;  %v556_v37 = vmul.f32 %v1080_v14, %v507_v10  ;;  %v1081_v34 = vld [vmem:[#allocation2 + $0x2e8] sm:$0xff] }
 0x174   :  { %v949_v38 = vpop.eup %948  ;;  %716 = vst [vmem:[#allocation5 + $0x78] sm:$0xff] %v947_v9  ;;  %968 = vtanh.f32 %v592_v36  ;;  %v602_v8 = vmul.f32 %v1081_v34, %v507_v10  ;;  %v1100_v14 = vld [vmem:[#allocation2 + $0x2a8] sm:$0xff]  ;;  %v1101_v34 = vld [vmem:[#allocation2 + $0x2b0] sm:$0xff] }
 0x175   :  { %v951_v32 = vpop.eup %950  ;;  %717 = vst [vmem:[#allocation5 + $0x80] sm:$0xff] %v949_v38  ;;  %970 = vtanh.f32 %v527_v45 }
 0x176   :  { %v953_v7 = vpop.eup %952  ;;  %718 = vst [vmem:[#allocation5 + $0x88] sm:$0xff] %v951_v32  ;;  %972 = vtanh.f32 %v528_v41  ;;  %v472_v41 = vpop.permute.xlu1 %471 }
 0x177   :  { %v955_v55 = vpop.eup %954  ;;  %764 = vst [vmem:[#allocation5 + $0x1f8] sm:$0xff] %v953_v7  ;;  %974 = vtanh.f32 %v529_v19  ;;  %v603_v19 = vmul.f32 %v1082_v23, %v507_v10 }
 0x178   :  { %v957_v56 = vpop.eup %956  ;;  %765 = vst [vmem:[#allocation5 + $0x200] sm:$0xff] %v955_v55  ;;  %976 = vtanh.f32 %v575_v20  ;;  %v604_v20 = vmul.f32 %v1083_v35, %v507_v10  ;;  %v1086_v55 = vld [vmem:[#allocation2 + $0xd0] sm:$0xff] }
 0x179   :  { %v959_v53 = vpop.eup %958  ;;  %766 = vst [vmem:[#allocation5 + $0x208] sm:$0xff] %v957_v56  ;;  %978 = vtanh.f32 %v576_v26  ;;  %v533_v26 = vmul.f32 %v1084_v42, %v472_v41  ;;  %v535_v25 = vmul.f32 %v1086_v55, %v472_v41  ;;  %v1087_v56 = vld [vmem:[#allocation2 + $0x240] sm:$0xff] }
 0x17a   :  { %v961_v12 = vpop.eup %960  ;;  %734 = vst [vmem:[#allocation5 + $0x108] sm:$0xff] %v959_v53  ;;  %980 = vtanh.f32 %v577_v27  ;;  %v534_v27 = vmul.f32 %v1085_v44, %v472_v41  ;;  %v581_v33 = vmul.f32 %v1087_v56, %v472_v41 }
 0x17b   :  { %v963_v17 = vpop.eup %962  ;;  %735 = vst [vmem:[#allocation5 + $0x110] sm:$0xff] %v961_v12  ;;  %982 = vtanh.f32 %v548_v11 }
 0x17c   :  { %v965_v59 = vpop.eup %964  ;;  %736 = vst [vmem:[#allocation5 + $0x118] sm:$0xff] %v963_v17  ;;  %984 = vtanh.f32 %v549_v61  ;;  %v482_v61 = vpop.permute.xlu1 %481  ;;  %v1090_v17 = vld [vmem:[#allocation2 + $0xf0] sm:$0xff] }
 0x17d   :  { %v967_v46 = vpop.eup %966  ;;  %782 = vst [vmem:[#allocation5 + $0x288] sm:$0xff] %v965_v59  ;;  %986 = vtanh.f32 %v550_v43  ;;  %v582_v43 = vmul.f32 %v1088_v60, %v472_v41  ;;  %v539_v21 = vmul.f32 %v1090_v17, %v482_v61  ;;  %v1091_v59 = vld [vmem:[#allocation2 + $0xf8] sm:$0xff] }
 0x17e   :  { %v969_v51 = vpop.eup %968  ;;  %783 = vst [vmem:[#allocation5 + $0x290] sm:$0xff] %v967_v46  ;;  %988 = vtanh.f32 %v596_v15  ;;  %v583_v15 = vmul.f32 %v1089_v13, %v472_v41  ;;  %v540_v39 = vmul.f32 %v1091_v59, %v482_v61  ;;  %v1092_v46 = vld [vmem:[#allocation2 + $0x100] sm:$0xff] }
 0x17f   :  { %v971_v0 = vpop.eup %970  ;;  %784 = vst [vmem:[#allocation5 + $0x298] sm:$0xff] %v969_v51  ;;  %990 = vtanh.f32 %v597_v54  ;;  %v541_v47 = vmul.f32 %v1092_v46, %v482_v61  ;;  %v1093_v51 = vld [vmem:[#allocation2 + $0x270] sm:$0xff] }
 0x180   :  { %v973_v2 = vpop.eup %972  ;;  %719 = vst [vmem:[#allocation5 + $0x90] sm:$0xff] %v971_v0  ;;  %992 = vtanh.f32 %v598_v50  ;;  %v587_v52 = vmul.f32 %v1093_v51, %v482_v61 }
 0x181   :  { %v975_v4 = vpop.eup %974  ;;  %720 = vst [vmem:[#allocation5 + $0x98] sm:$0xff] %v973_v2  ;;  %994 = vtanh.f32 %v530_v48 }
 0x182   :  { %v977_v49 = vpop.eup %976  ;;  %721 = vst [vmem:[#allocation5 + $0xa0] sm:$0xff] %v975_v4  ;;  %996 = vtanh.f32 %v531_v18  ;;  %v492_v18 = vpop.permute.xlu1 %491  ;;  %v1096_v4 = vld [vmem:[#allocation2 + $0x120] sm:$0xff] }
 0x183   :  { %v979_v28 = vpop.eup %978  ;;  %767 = vst [vmem:[#allocation5 + $0x210] sm:$0xff] %v977_v49  ;;  %998 = vtanh.f32 %v532_v22  ;;  %v588_v22 = vmul.f32 %v1094_v1, %v482_v61  ;;  %v545_v40 = vmul.f32 %v1096_v4, %v492_v18  ;;  %v1097_v49 = vld [vmem:[#allocation2 + $0x128] sm:$0xff] }
 0x184   :  { %v981_v63 = vpop.eup %980  ;;  %768 = vst [vmem:[#allocation5 + $0x218] sm:$0xff] %v979_v28  ;;  %1000 = vtanh.f32 %v578_v57  ;;  %v589_v57 = vmul.f32 %v1095_v3, %v482_v61  ;;  %v546_v58 = vmul.f32 %v1097_v49, %v492_v18  ;;  %v1098_v28 = vld [vmem:[#allocation2 + $0x130] sm:$0xff] }
 0x185   :  { %v983_v36 = vpop.eup %982  ;;  %769 = vst [vmem:[#allocation5 + $0x220] sm:$0xff] %v981_v63  ;;  %1002 = vtanh.f32 %v579_v5  ;;  %v547_v29 = vmul.f32 %v1098_v28, %v492_v18  ;;  %v1099_v63 = vld [vmem:[#allocation2 + $0x2a0] sm:$0xff] }
 0x186   :  { %v985_v45 = vpop.eup %984  ;;  %740 = vst [vmem:[#allocation5 + $0x138] sm:$0xff] %v983_v36  ;;  %1004 = vtanh.f32 %v580_v24  ;;  %v593_v31 = vmul.f32 %v1099_v63, %v492_v18 }
 0x187   :  { %v987_v9 = vpop.eup %986  ;;  %741 = vst [vmem:[#allocation5 + $0x140] sm:$0xff] %v985_v45  ;;  %1006 = vtanh.f32 %v554_v30 }
 0x188   :  { %v989_v38 = vpop.eup %988  ;;  %742 = vst [vmem:[#allocation5 + $0x148] sm:$0xff] %v987_v9  ;;  %1008 = vtanh.f32 %v555_v6  ;;  %v502_v6 = vpop.permute.xlu1 %501  ;;  %v1102_v9 = vld [vmem:[#allocation2 + $0x150] sm:$0xff] }
 0x189   :  { %v991_v32 = vpop.eup %990  ;;  %788 = vst [vmem:[#allocation5 + $0x2b8] sm:$0xff] %v989_v38  ;;  %1010 = vtanh.f32 %v556_v37  ;;  %v594_v37 = vmul.f32 %v1100_v14, %v492_v18  ;;  %v551_v23 = vmul.f32 %v1102_v9, %v502_v6  ;;  %v1103_v38 = vld [vmem:[#allocation2 + $0x158] sm:$0xff] }
 0x18a   :  { %v993_v7 = vpop.eup %992  ;;  %789 = vst [vmem:[#allocation5 + $0x2c0] sm:$0xff] %v991_v32  ;;  %1012 = vtanh.f32 %v602_v8  ;;  %v595_v8 = vmul.f32 %v1101_v34, %v492_v18  ;;  %v552_v35 = vmul.f32 %v1103_v38, %v502_v6  ;;  %v1104_v32 = vld [vmem:[#allocation2 + $0x160] sm:$0xff] }
 0x18b   :  { %v995_v62 = vpop.eup %994  ;;  %790 = vst [vmem:[#allocation5 + $0x2c8] sm:$0xff] %v993_v7  ;;  %1014 = vtanh.f32 %v603_v19  ;;  %v553_v42 = vmul.f32 %v1104_v32, %v502_v6  ;;  %v1105_v7 = vld [vmem:[#allocation2 + $0x2d0] sm:$0xff] }
 0x18c   :  { %v997_v11 = vpop.eup %996  ;;  %722 = vst [vmem:[#allocation5 + $0xa8] sm:$0xff] %v995_v62  ;;  %1016 = vtanh.f32 %v604_v20  ;;  %v599_v44 = vmul.f32 %v1105_v7, %v502_v6  ;;  %v1106_v62 = vld [vmem:[#allocation2 + $0x2d8] sm:$0xff] }
 0x18d   :  { %v999_v53 = vpop.eup %998  ;;  %723 = vst [vmem:[#allocation5 + $0xb0] sm:$0xff] %v997_v11  ;;  %1018 = vtanh.f32 %v533_v26  ;;  %v600_v55 = vmul.f32 %v1106_v62, %v502_v6  ;;  %v1107_v11 = vld [vmem:[#allocation2 + $0x2e0] sm:$0xff] }
 0x18e   :  { %v1001_v12 = vpop.eup %1000  ;;  %724 = vst [vmem:[#allocation5 + $0xb8] sm:$0xff] %v999_v53  ;;  %1020 = vtanh.f32 %v534_v27  ;;  %v601_v56 = vmul.f32 %v1107_v11, %v502_v6 }
 0x18f   :  { %v1003_v16 = vpop.eup %1002  ;;  %770 = vst [vmem:[#allocation5 + $0x228] sm:$0xff] %v1001_v12  ;;  %1022 = vtanh.f32 %v535_v25 }
 0x190   :  { %v1005_v54 = vpop.eup %1004  ;;  %771 = vst [vmem:[#allocation5 + $0x230] sm:$0xff] %v1003_v16  ;;  %1024 = vtanh.f32 %v581_v33 }
 0x191   :  { %v1007_v50 = vpop.eup %1006  ;;  %772 = vst [vmem:[#allocation5 + $0x238] sm:$0xff] %v1005_v54  ;;  %1026 = vtanh.f32 %v582_v43 }
 0x192   :  { %v1009_v48 = vpop.eup %1008  ;;  %746 = vst [vmem:[#allocation5 + $0x168] sm:$0xff] %v1007_v50  ;;  %1028 = vtanh.f32 %v583_v15 }
 0x193   :  { %v1011_v0 = vpop.eup %1010  ;;  %747 = vst [vmem:[#allocation5 + $0x170] sm:$0xff] %v1009_v48  ;;  %1030 = vtanh.f32 %v539_v21 }
 0x194   :  { %v1013_v2 = vpop.eup %1012  ;;  %748 = vst [vmem:[#allocation5 + $0x178] sm:$0xff] %v1011_v0  ;;  %1032 = vtanh.f32 %v540_v39 }
 0x195   :  { %v1015_v10 = vpop.eup %1014  ;;  %794 = vst [vmem:[#allocation5 + $0x2e8] sm:$0xff] %v1013_v2  ;;  %1034 = vtanh.f32 %v541_v47 }
 0x196   :  { %v1017_v5 = vpop.eup %1016  ;;  %795 = vst [vmem:[#allocation5 + $0x2f0] sm:$0xff] %v1015_v10  ;;  %1036 = vtanh.f32 %v587_v52 }
 0x197   :  { %v1019_v24 = vpop.eup %1018  ;;  %796 = vst [vmem:[#allocation5 + $0x2f8] sm:$0xff] %v1017_v5  ;;  %1038 = vtanh.f32 %v588_v22 }
 0x198   :  { %v1021_v30 = vpop.eup %1020  ;;  %725 = vst [vmem:[#allocation5 + $0xc0] sm:$0xff] %v1019_v24  ;;  %1040 = vtanh.f32 %v589_v57 }
 0x199   :  { %v1023_v36 = vpop.eup %1022  ;;  %726 = vst [vmem:[#allocation5 + $0xc8] sm:$0xff] %v1021_v30  ;;  %1042 = vtanh.f32 %v545_v40 }
 0x19a   :  { %v1025_v45 = vpop.eup %1024  ;;  %727 = vst [vmem:[#allocation5 + $0xd0] sm:$0xff] %v1023_v36  ;;  %1044 = vtanh.f32 %v546_v58 }
 0x19b   :  { %v1027_v41 = vpop.eup %1026  ;;  %773 = vst [vmem:[#allocation5 + $0x240] sm:$0xff] %v1025_v45  ;;  %1046 = vtanh.f32 %v547_v29 }
 0x19c   :  { %v1029_v19 = vpop.eup %1028  ;;  %774 = vst [vmem:[#allocation5 + $0x248] sm:$0xff] %v1027_v41  ;;  %1048 = vtanh.f32 %v593_v31 }
 0x19d   :  { %v1031_v20 = vpop.eup %1030  ;;  %775 = vst [vmem:[#allocation5 + $0x250] sm:$0xff] %v1029_v19  ;;  %1050 = vtanh.f32 %v594_v37 }
 0x19e   :  { %v1033_v26 = vpop.eup %1032  ;;  %731 = vst [vmem:[#allocation5 + $0xf0] sm:$0xff] %v1031_v20  ;;  %1052 = vtanh.f32 %v595_v8 }
 0x19f   :  { %v1035_v27 = vpop.eup %1034  ;;  %732 = vst [vmem:[#allocation5 + $0xf8] sm:$0xff] %v1033_v26  ;;  %1054 = vtanh.f32 %v551_v23 }
 0x1a0   :  { %v1037_v25 = vpop.eup %1036  ;;  %733 = vst [vmem:[#allocation5 + $0x100] sm:$0xff] %v1035_v27  ;;  %1056 = vtanh.f32 %v552_v35 }
 0x1a1   :  { %v1039_v33 = vpop.eup %1038  ;;  %779 = vst [vmem:[#allocation5 + $0x270] sm:$0xff] %v1037_v25  ;;  %1058 = vtanh.f32 %v553_v42 }
 0x1a2   :  { %v1041_v61 = vpop.eup %1040  ;;  %780 = vst [vmem:[#allocation5 + $0x278] sm:$0xff] %v1039_v33  ;;  %1060 = vtanh.f32 %v599_v44 }
 0x1a3   :  { %v1043_v53 = vpop.eup %1042  ;;  %781 = vst [vmem:[#allocation5 + $0x280] sm:$0xff] %v1041_v61  ;;  %1062 = vtanh.f32 %v600_v55 }
 0x1a4   :  { %v1045_v60 = vpop.eup %1044  ;;  %737 = vst [vmem:[#allocation5 + $0x120] sm:$0xff] %v1043_v53  ;;  %1064 = vtanh.f32 %v601_v56 }
 0x1a5   :  { %v1047_v43 = vpop.eup %1046  ;;  %738 = vst [vmem:[#allocation5 + $0x128] sm:$0xff] %v1045_v60 }
 0x1a6   :  { %v1049_v12 = vpop.eup %1048  ;;  %739 = vst [vmem:[#allocation5 + $0x130] sm:$0xff] %v1047_v43 }
 0x1a7   :  { %v1051_v13 = vpop.eup %1050  ;;  %785 = vst [vmem:[#allocation5 + $0x2a0] sm:$0xff] %v1049_v12 }
 0x1a8   :  { %v1053_v15 = vpop.eup %1052  ;;  %786 = vst [vmem:[#allocation5 + $0x2a8] sm:$0xff] %v1051_v13 }
 0x1a9   :  { %v1055_v16 = vpop.eup %1054  ;;  %787 = vst [vmem:[#allocation5 + $0x2b0] sm:$0xff] %v1053_v15 }
 0x1aa   :  { %v1057_v17 = vpop.eup %1056  ;;  %743 = vst [vmem:[#allocation5 + $0x150] sm:$0xff] %v1055_v16 }
 0x1ab   :  { %v1059_v21 = vpop.eup %1058  ;;  %744 = vst [vmem:[#allocation5 + $0x158] sm:$0xff] %v1057_v17 }
 0x1ac   :  { %v1061_v54 = vpop.eup %1060  ;;  %745 = vst [vmem:[#allocation5 + $0x160] sm:$0xff] %v1059_v21 }
 0x1ad   :  { %v1063_v59 = vpop.eup %1062  ;;  %791 = vst [vmem:[#allocation5 + $0x2d0] sm:$0xff] %v1061_v54 }
 0x1ae   :  { %v1065_v39 = vpop.eup %1064  ;;  %792 = vst [vmem:[#allocation5 + $0x2d8] sm:$0xff] %v1063_v59 }
 0x1af   :  { %793 = vst [vmem:[#allocation5 + $0x2e0] sm:$0xff] %v1065_v39 }
 0x1b0   :  { %1141 = shalt.err (!%p1138_p12)
}
 0x1b1   :  { %s1142_s13 = scalar_lea.hbm %s1541_s2, 12288 }
 0x1b2   :  { %p1143_p13 = scmp.ne.s32.totalorder %s1541_s2, %s1142_s13  ;;  %p1146_p0 = scmp.lt.u32.totalorder %s1142_s13, %s1541_s2 }
 0x1b4   :  { %p1148_p1 = pnand %p1146_p0, %p1143_p13 }
 0x1b6   :  { %1151 = shalt.err (!%p1148_p1)
}
 0x1b7   :  { %825 = dma.vmem_to_hbm [thread:$0]  %s820_s9, 12288, %s1541_s2, [#allocation4], %s1157_s22, %s1157_s22, %s1158_s23  }
 0x1b8   :  { %1154 = dma.done.wait [#allocation4], 12288  }
 0x1b9   :  { %1155 = vsyncadd [#allocation4], 4294955008 }
 0x1ba   :  { %833 = vsyncpa [#allocation3], 1 }
 0x1bb   :  { %834 = vsyncpa [#allocation4], 1 }

</bundles_post_ra>
